<compile_context>
chip_gen: v7x
topology: tpu7x:2x2x1
jax: 0.10.0
libtpu: 0.0.40
codegen_flags: <defaults>
</compile_context>

<pallas_src>
import jax
import jax.numpy as jnp
from jax.experimental import pallas as pl
from jax.experimental.pallas import tpu as pltpu


def _round_up(x, m):
    return ((x + m - 1) // m) * m


def _lora_kernel(alpha_ref, x_ref, a_ref, b_ref, o_ref, xa_ref):
    """One (i, k) grid step: accumulate x_tile @ A_tile; on the last k apply B."""
    k = pl.program_id(1)

    @pl.when(k == 0)
    def _():
        xa_ref[...] = jnp.zeros_like(xa_ref)

    # First matmul: (tm, tk) @ (tk, rank_p), accumulated in f32.
    xa_ref[...] += jnp.dot(
        x_ref[...], a_ref[...], preferred_element_type=jnp.float32
    )

    @pl.when(k == pl.num_programs(1) - 1)
    def _():
        # Scale the small (tm, rank_p) intermediate instead of the wide output.
        alpha = alpha_ref[0]
        xa = (alpha * xa_ref[...]).astype(b_ref.dtype)
        out = jnp.dot(xa, b_ref[...], preferred_element_type=jnp.float32)
        o_ref[...] = out.astype(o_ref.dtype)


def lora_forward(x, A, B, alpha, *, tm=256, tk=512,
                 compute_dtype=jnp.bfloat16):
    """Computes alpha * (x @ A @ B).  x:(batch,in_dim) A:(in_dim,rank) B:(rank,out_dim)."""
    batch, in_dim = x.shape
    in_dim_a, rank = A.shape
    rank_b, out_dim = B.shape
    assert in_dim == in_dim_a and rank == rank_b
    out_dtype = x.dtype

    # bf16 compute halves HBM traffic on the x stream; dots still accumulate f32.
    x = x.astype(compute_dtype)
    A = A.astype(compute_dtype)
    B = B.astype(compute_dtype)

    # Lane/sublane-aligned, zero-padded tiling (zero padding cannot change the result).
    tm = min(tm, _round_up(batch, 16))
    tk = min(tk, _round_up(in_dim, 128))
    M = _round_up(batch, tm)
    K = _round_up(in_dim, tk)
    R = _round_up(rank, 128)
    N = _round_up(out_dim, 128)

    x_p = jnp.pad(x, ((0, M - batch), (0, K - in_dim)))
    A_p = jnp.pad(A, ((0, K - in_dim), (0, R - rank)))
    B_p = jnp.pad(B, ((0, R - rank), (0, N - out_dim)))

    grid = (M // tm, K // tk)
    itemsize = jnp.dtype(compute_dtype).itemsize
    out_itemsize = jnp.dtype(out_dtype).itemsize

    # Double-buffered VMEM footprint estimate -> explicit scoped limit with
    # headroom, capped at 64 MiB so the same config is safe on v7x.
    vmem_bytes = (2 * tm * tk * itemsize        # x tiles
                  + 2 * tk * R * itemsize       # A tiles
                  + 2 * R * N * itemsize        # B (resident)
                  + 2 * tm * N * out_itemsize   # output tile
                  + tm * R * 4)                 # f32 accumulator
    vmem_limit = min(64 * 1024 * 1024,
                     max(32 * 1024 * 1024, int(1.5 * vmem_bytes)))

    cost = pl.CostEstimate(
        flops=2 * M * K * R + 2 * M * R * N,
        transcendentals=0,
        bytes_accessed=(M * K + K * R + R * N) * itemsize + M * N * out_itemsize,
    )

    alpha_arr = jnp.asarray([alpha], dtype=jnp.float32)

    out_padded = pl.pallas_call(
        _lora_kernel,
        out_shape=jax.ShapeDtypeStruct((M, N), out_dtype),
        grid_spec=pltpu.PrefetchScalarGridSpec(
            num_scalar_prefetch=0,
            grid=grid,
            in_specs=[
                # alpha: runtime scalar in SMEM -> no recompile per alpha value.
                pl.BlockSpec(memory_space=pltpu.MemorySpace.SMEM),
                pl.BlockSpec((tm, tk), lambda i, k: (i, k)),
                pl.BlockSpec((tk, R), lambda i, k: (k, 0)),
                pl.BlockSpec((R, N), lambda i, k: (0, 0)),
            ],
            out_specs=pl.BlockSpec((tm, N), lambda i, k: (i, 0)),
            scratch_shapes=[pltpu.VMEM((tm, R), jnp.float32)],
        ),
        compiler_params=pltpu.CompilerParams(
            dimension_semantics=("parallel", "arbitrary"),
            vmem_limit_bytes=vmem_limit,
        ),
        cost_estimate=cost,
    )(alpha_arr, x_p, A_p, B_p)

    return out_padded[:batch, :out_dim]


if __name__ == "__main__":
    key = jax.random.PRNGKey(0)

    def make_case(case_key, batch, in_dim, rank, out_dim):
        k_x, k_a, k_b = jax.random.split(case_key, 3)
        std_dev = 1.0 / jnp.sqrt(jnp.float32(rank))
        A = jax.random.normal(k_a, (in_dim, rank), dtype=jnp.float32) * std_dev
        # NOTE: the PyTorch module inits B to zeros; use a random B here so the
        # test actually exercises the second matmul and the alpha scale.
        B = jax.random.normal(k_b, (rank, out_dim), dtype=jnp.float32) * 0.05
        x = jax.random.normal(k_x, (batch, in_dim), dtype=jnp.float32)
        return x, A, B

    def check(x, A, B, alpha, compute_dtype, tol):
        out = jax.block_until_ready(
            lora_forward(x, A, B, alpha, compute_dtype=compute_dtype))
        ref = alpha * jnp.dot(jnp.dot(x, A, precision="highest"), B,
                              precision="highest")
        assert out.shape == ref.shape
        err = jnp.linalg.norm(out.astype(jnp.float32) - ref) / (
            jnp.linalg.norm(ref) + 1e-12)
        assert float(err) < tol, f"relative error {float(err)} >= {tol}"

    k1, k2 = jax.random.split(key)

    # Case 1: tile-aligned shapes, exercises a (2, 2) grid with k-accumulation
    # and the parallel batch axis; f32 compute path, tight-ish tolerance.
    x1, A1, B1 = make_case(k1, batch=512, in_dim=1024, rank=16, out_dim=256)
    check(x1, A1, B1, alpha=2.0, compute_dtype=jnp.float32, tol=5e-3)

    # Case 2: ragged (unaligned) shapes, exercises the zero-padding path;
    # default bf16 compute, looser tolerance.
    x2, A2, B2 = make_case(k2, batch=100, in_dim=300, rank=8, out_dim=72)
    check(x2, A2, B2, alpha=0.5, compute_dtype=jnp.bfloat16, tol=2e-2)

    print("KERNEL_OK")
</pallas_src>

<mosaic_0001>
module attributes {stable_mosaic.version = 11 : i64} {
  func.func @_lora_kernel(%arg0: i32, %arg1: i32, %arg2: memref<1xf32, #tpu.memory_space<smem>>, %arg3: memref<256x512xf32, #tpu.memory_space<vmem>>, %arg4: memref<512x128xf32, #tpu.memory_space<vmem>>, %arg5: memref<128x256xf32, #tpu.memory_space<vmem>>, %arg6: memref<256x256xf32, #tpu.memory_space<vmem>>, %arg7: memref<256x128xf32, #tpu.memory_space<vmem>>) attributes {dimension_semantics = [#tpu.dimension_semantics<parallel>, #tpu.dimension_semantics<arbitrary>], iteration_bounds = array<i64: 2, 2>, scalar_prefetch = 0 : i64, scratch_operands = 1 : i64, tpu.core_type = #tpu.core_type<tc>, window_params = [{transform_indices = @transform_0, window_bounds = array<i64: 1>}, {transform_indices = @transform_1, window_bounds = array<i64: 256, 512>}, {transform_indices = @transform_2, window_bounds = array<i64: 512, 128>}, {pipeline_mode = #tpu.pipeline_mode<synchronous>, transform_indices = @transform_3, window_bounds = array<i64: 128, 256>}, {transform_indices = @transform_4, window_bounds = array<i64: 256, 256>}]} {
    %c0_i32 = arith.constant 0 : i32
    %0 = arith.cmpi eq, %arg1, %c0_i32 : i32
    %1 = arith.extui %0 : i1 to i32
    %c0_i32_0 = arith.constant 0 : i32
    %2 = arith.cmpi ne, %1, %c0_i32_0 : i32
    scf.if %2 {
      %cst_9 = arith.constant 0.000000e+00 : f32
      %12 = vector.broadcast %cst_9 : f32 to vector<256x128xf32>
      %c0_10 = arith.constant 0 : index
      %c0_11 = arith.constant 0 : index
      %13 = vector.load %arg7[%c0_10, %c0_11] : memref<256x128xf32, #tpu.memory_space<vmem>>, vector<256x128xf32>
      tpu.vector_store %arg7[%c0_10, %c0_11], %12 {strides = array<i32>} : memref<256x128xf32, #tpu.memory_space<vmem>>, vector<256x128xf32>,
    } else {
    }
    %c0 = arith.constant 0 : index
    %c0_1 = arith.constant 0 : index
    %3 = vector.load %arg7[%c0, %c0_1] : memref<256x128xf32, #tpu.memory_space<vmem>>, vector<256x128xf32>
    %c0_2 = arith.constant 0 : index
    %c0_3 = arith.constant 0 : index
    %4 = vector.load %arg3[%c0_2, %c0_3] : memref<256x512xf32, #tpu.memory_space<vmem>>, vector<256x512xf32>
    %c0_4 = arith.constant 0 : index
    %c0_5 = arith.constant 0 : index
    %5 = vector.load %arg4[%c0_4, %c0_5] : memref<512x128xf32, #tpu.memory_space<vmem>>, vector<512x128xf32>
    %cst = arith.constant dense<0.000000e+00> : vector<256x128xf32>
    %6 = tpu.matmul %4, %5, %cst {dimension_numbers = #tpu.dot_dimension_numbers<[1], [0], [0], [1], [0, 0, 1, 1], [], []>} : vector<256x512xf32>, vector<512x128xf32>, vector<256x128xf32> -> vector<256x128xf32>
    %7 = arith.addf %3, %6 : vector<256x128xf32>
    %c0_6 = arith.constant 0 : index
    %c0_7 = arith.constant 0 : index
    %8 = vector.load %arg7[%c0_6, %c0_7] : memref<256x128xf32, #tpu.memory_space<vmem>>, vector<256x128xf32>
    tpu.vector_store %arg7[%c0_6, %c0_7], %7 {strides = array<i32>} : memref<256x128xf32, #tpu.memory_space<vmem>>, vector<256x128xf32>,
    %c1_i32 = arith.constant 1 : i32
    %9 = arith.cmpi eq, %arg1, %c1_i32 : i32
    %10 = arith.extui %9 : i1 to i32
    %c0_i32_8 = arith.constant 0 : i32
    %11 = arith.cmpi ne, %10, %c0_i32_8 : i32
    scf.if %11 {
      %c0_9 = arith.constant 0 : index
      %12 = memref.load %arg2[%c0_9] : memref<1xf32, #tpu.memory_space<smem>>
      %c0_10 = arith.constant 0 : index
      %c0_11 = arith.constant 0 : index
      %13 = vector.load %arg7[%c0_10, %c0_11] : memref<256x128xf32, #tpu.memory_space<vmem>>, vector<256x128xf32>
      %14 = vector.broadcast %12 : f32 to vector<256x128xf32>
      %15 = arith.mulf %14, %13 : vector<256x128xf32>
      %c0_12 = arith.constant 0 : index
      %c0_13 = arith.constant 0 : index
      %16 = vector.load %arg5[%c0_12, %c0_13] : memref<128x256xf32, #tpu.memory_space<vmem>>, vector<128x256xf32>
      %cst_14 = arith.constant dense<0.000000e+00> : vector<256x256xf32>
      %17 = tpu.matmul %15, %16, %cst_14 {dimension_numbers = #tpu.dot_dimension_numbers<[1], [0], [0], [1], [0, 0, 1, 1], [], []>} : vector<256x128xf32>, vector<128x256xf32>, vector<256x256xf32> -> vector<256x256xf32>
      %c0_15 = arith.constant 0 : index
      %c0_16 = arith.constant 0 : index
      %18 = vector.load %arg6[%c0_15, %c0_16] : memref<256x256xf32, #tpu.memory_space<vmem>>, vector<256x256xf32>
      tpu.vector_store %arg6[%c0_15, %c0_16], %17 {strides = array<i32>} : memref<256x256xf32, #tpu.memory_space<vmem>>, vector<256x256xf32>,
    } else {
    }
    return
  }
  func.func @transform_0(%arg0: i32, %arg1: i32) -> i32 {
    %c0_i32 = arith.constant 0 : i32
    %c0_i32_0 = arith.constant 0 : i32
    return %c0_i32 : i32
  }
  func.func @transform_1(%arg0: i32, %arg1: i32) -> (i32, i32) {
    %c0_i32 = arith.constant 0 : i32
    return %arg0, %arg1 : i32, i32
  }
  func.func @transform_2(%arg0: i32, %arg1: i32) -> (i32, i32) {
    %c0_i32 = arith.constant 0 : i32
    %c0_i32_0 = arith.constant 0 : i32
    return %arg1, %c0_i32 : i32, i32
  }
  func.func @transform_3(%arg0: i32, %arg1: i32) -> (i32, i32) {
    %c0_i32 = arith.constant 0 : i32
    %c0_i32_0 = arith.constant 0 : i32
    %c0_i32_1 = arith.constant 0 : i32
    return %c0_i32, %c0_i32_0 : i32, i32
  }
  func.func @transform_4(%arg0: i32, %arg1: i32) -> (i32, i32) {
    %c0_i32 = arith.constant 0 : i32
    %c0_i32_0 = arith.constant 0 : i32
    return %arg0, %c0_i32 : i32, i32
  }
}

</mosaic_0001>

<bundles_post_ra>
// kernel: tpu_custom_call.1
= control target key start
LH: loop header
LB: loop body
LE: loop exit
PB: predicated region body
PF: predicated region fallthrough
CT: control target
= control target key end

     0   :  { %s2971_s0 = inlined_call_operand.<no memory space> [shape: f32[1], index: 0, kind: input, shape index: {}]   ;;  %s2972_s1 = inlined_call_operand.hbm [shape: f32[512,1024], index: 1, kind: input, shape index: {}]   ;;  %s2973_s2 = inlined_call_operand.hbm [shape: f32[1024,128], index: 2, kind: input, shape index: {}]   ;;  %s2974_s3 = inlined_call_operand.hbm [shape: f32[128,256], index: 3, kind: input, shape index: {}]   ;;  %s2975_s4 = inlined_call_operand.hbm [shape: f32[512,256], index: 4, kind: output, shape index: {}]  }
   0x1   :  { %2996 = sst [smem:[#allocation25_spill]] %s2974_s3 }
   0x2   :  { %2997 = sst [smem:[#allocation26_spill]] %s2975_s4 }
   0x3   :  { %9 = sst [smem:[#allocation3]] %s2971_s0 }
   0x4   :  { %10 = vsyncpa [#allocation5], 0 }
   0x5   :  { %12 = vsyncpa [#allocation5 + $0x1], 0 }
   0x6   :  { %13 = vsyncpa [#allocation8], 0 }
   0x7   :  { %15 = vsyncpa [#allocation8 + $0x1], 0 }
   0x8   :  { %16 = vsyncpa [#allocation6], 0 }
   0x9   :  { %18 = vsyncpa [#allocation6 + $0x1], 0  ;;  %s2239_s17 = smov 0   ;;  %s2241_s18 = smov 0  }
   0xa   :  { %s2243_s19 = smov 0   ;;  %s2245_s20 = smov 0  }
   0xb   :  { %s2247_s21 = smov 0   ;;  %s2249_s22 = smov 0  }
   0xc   :  { %s2251_s23 = smov 0   ;;  %s2253_s0 = smov 0  }
   0xd   :  { %s2255_s24 = smov 0   ;;  %s2257_s25 = smov 0  }
   0xe   :  { %s2259_s26 = smov 0   ;;  %s2261_s27 = smov 0  }
   0xf   :  { %s2263_s28 = smov 0   ;;  %s2265_s29 = smov 0  }
  0x10 LB: > { %2998 = sst [smem:[#allocation15_spill]] %s2141_s17  ;;  %s2306_s30 = sadd.s32 4294967295, %s2193_s29   ;;  %s2193_s29 = sphi %s2265_s29, %s24_s29   ;;  %s2189_s28 = sphi %s2263_s28, %s3056_s28   ;;  %s2185_s27 = sphi %s2261_s27, %s3055_s27   ;;  %s2181_s26 = sphi %s2259_s26, %s3054_s26   ;;  %s2177_s25 = sphi %s2257_s25, %s3053_s25   ;;  %s2173_s24 = sphi %s2255_s24, %s3052_s24   ;;  %s2169_s0 = sphi %s2253_s0, %s3051_s0   ;;  %s2165_s23 = sphi %s2251_s23, %s3050_s23   ;;  %s2161_s22 = sphi %s2249_s22, %s3049_s22   ;;  %s2157_s21 = sphi %s2247_s21, %s3048_s21   ;;  %s2153_s20 = sphi %s2245_s20, %s3047_s20   ;;  %s2149_s19 = sphi %s2243_s19, %s3046_s19   ;;  %s2145_s18 = sphi %s2241_s18, %s3045_s18   ;;  %s2141_s17 = sphi %s2239_s17, %s3044_s17  }
  0x11   : > { %2999 = sst [smem:[#allocation16_spill]] %s2145_s18  ;;  %s1624_s5 = sadd.s32 4294967294, %s2193_s29  }
  0x12   : > { %3000 = sst [smem:[#allocation17_spill]] %s2177_s25  ;;  %p79_p0 = scmp.ne.s32.totalorder %s2169_s0, %s2165_s23 }
  0x13   : > { %3001 = sst [smem:[#allocation18_spill]] %s2181_s26  ;;  %p2977_p1 = scmp.eq.s32.totalorder %s2306_s30, 0 }
  0x14   : > { %3002 = sst [smem:[#allocation19_spill]] %s2306_s30  ;;  %p105_p2 = scmp.ne.s32.totalorder %s2157_s21, %s2153_s20 }
  0x15   : > { %p2315_p3 = por %p2977_p1, %p79_p0  ;;  %p149_p4 = scmp.ne.s32.totalorder %s2149_s19, %s2145_s18 }
  0x16   : > { %p2323_p5 = por %p105_p2, %p2977_p1  ;;  %p150_p6 = scmp.eq.s32.totalorder %s2306_s30, 3 }
  0x17   : > { %s3003_s7 = scalar_select %p2315_p3, 1, 0 }
  0x18   : > { %s3004_s8 = scalar_select %p2323_p5, 1, 0 }
  0x19   : > { %p155_p7 = scmp.ne.s32.totalorder %s2145_s18, %s2141_s17  ;;  %p156_p8 = scmp.eq.s32.totalorder %s1624_s5, 3 }
  0x1a   : > { %3005 = sst [smem:[#allocation20_spill]] %s3004_s8  ;;  %p2330_p9 = por %p150_p6, %p149_p4 }
  0x1b   : > { %p1625_p10 = scmp.ge.s32.totalorder %s2193_s29, 1  ;;  %p2335_p11 = por %p156_p8, %p155_p7 }
  0x1c   : > { %s3006_s9 = scalar_select %p2330_p9, 1, 0 }
  0x1d   : > { %s3008_s10 = scalar_select %p2335_p11, 1, 0 }
  0x1e   : > { %3007 = sst [smem:[#allocation21_spill]] %s3006_s9  ;;  %p163_p12 = scmp.lt.s32.totalorder %s2193_s29, 5 }
  0x1f   : > { %3009 = sst [smem:[#allocation22_spill]] %s3008_s10  ;;  %s2195_s12 = smov [#allocation9]  }
  0x20   : > { %p2340_p13 = pnand %p1625_p10, %p163_p12  ;;  %s178_s13 = sshll.u32 %s2195_s12, 4  ;;  %s179_s13 = int_to_ptr.vmem [resolvable:$true] %s178_s13 }
  0x21   : > { %s3012_s3 = sld [smem:[#allocation25_spill]] }
  0x22   : > { %s3010_s11 = scalar_select %p2340_p13, 1, 0 }
  0x23   : > { %p1807_p0 = pneg %p2340_p13 }
  0x25   : > { %p2348_p2 = pnand %p1807_p0, %p2977_p1 }
  0x27   : > { %s1951_s20 = scalar_lea.hbm %s3012_s3, 4096  ;;  %p1953_p6 = pneg %p2348_p2 }
  0x28   : > { %p1952_p4 = scmp.ne.s32.totalorder %s3012_s3, %s1951_s20  ;;  %p1958_p10 = scmp.lt.u32.totalorder %s1951_s20, %s3012_s3 }
  0x2a   : > { %p1954_p7 = pnand %p1953_p6, %p1952_p4 }
  0x2c   : > { %p1955_p8 = pneg %p1954_p7 }
  0x2e   : > { %p1960_p12 = pnand %p1958_p10, %p1955_p8 }
  0x30   : > { %1963 = shalt.err (!%p1960_p12)
}
  0x31   : > { %s1964_s10 = scalar_lea.vmem %s179_s13, 4096  ;;  %p1972_p9 = scmp.lt.s32.totalorder %s179_s13, %s179_s13 }
  0x32   : > { %p1965_p0 = scmp.ne.s32.totalorder %s179_s13, %s1964_s10  ;;  %p1973_p5 = scmp.lt.s32.totalorder %s1964_s10, %s1964_s10 }
  0x34   : > { %p1967_p1 = pnand %p1965_p0, %p1953_p6  ;;  %p1974_p3 = por %p1973_p5, %p1972_p9 }
  0x36   : > { %p1968_p11 = pneg %p1967_p1 }
  0x38   : > { %p1975_p13 = pnand %p1974_p3, %p1968_p11 }
  0x3a   : > { %1978 = shalt.err (!%p1975_p13)
}
  0x3b   : > { %s2196_s15 = smov 256   ;;  %s2197_s6 = smov 16  }
  0x3c   : > { %1810 = dma.hbm_to_vmem [thread:$0]  (!%p2348_p2), %s3012_s3, 4096, %s179_s13, [#allocation8], %s2196_s15, %s2196_s15, %s2197_s6  }
  0x3d   : > { %s33_s10 = sadd.s32 1, %s2185_s27  ;;  %s36_s23 = sadd.s32 1, %s2189_s28 }
  0x3e   : > { %p34_p1 = scmp.ge.s32.totalorder %s33_s10, 2  ;;  %s66_s5 = sadd.s32 1, %s2173_s24 }
  0x3f   : > { %p73_p3 = scmp.ne.s32.totalorder %s2173_s24, %s2169_s0  ;;  %p2995_p5 = scmp.eq.s32.totalorder %s2193_s29, 0 }
  0x40   : > { %s3058_s10 = smov (%p34_p1, %s33_s10), 0  ;;  %s3060_s23 = smov (!%p34_p1, %s36_s23), %s2189_s28 }
  0x41   : > { %3013 = sst [smem:[#allocation23_spill]] %s3058_s10  ;;  %s2378_s14 = ssub.s32 %s2185_s27, %s3058_s10 }
  0x42   : > { %p38_p9 = scmp.ge.s32.totalorder %s3060_s23, 2  ;;  %p90_p11 = scmp.eq.s32.totalorder %s2378_s14, 0 }
  0x43   : > { %p2384_p13 = por %p2995_p5, %p73_p3  ;;  %p2994_p2 = scmp.lt.s32.totalorder %s2193_s29, 4 }
  0x44   : > { %s3062_s23 = smov (%p38_p9, %s3060_s23), 0  ;;  %s192_s12 = sand.u32 1, %s2173_s24  }
  0x45   : > { %3015 = sst [smem:[#allocation24_spill]] %s3062_s23  ;;  %s1630_s15 = sshll.u32 %s2185_s27, 2 }
  0x46   : > { %s61_s6 = ssub.s32 %s2189_s28, %s3062_s23  ;;  %s1628_s20 = sshll.u32 %s192_s12, 10 }
  0x47   : > { %s63_s16 = sor.u32 %s2378_s14, %s61_s6  ;;  %p137_p4 = scmp.eq.s32.totalorder %s61_s6, 0 }
  0x48   : > { %p64_p6 = scmp.eq.s32.totalorder %s63_s16, 0  ;;  %s3016_s3 = sadd.s32 1, %s2149_s19 }
  0x49   : > { %s2399_s10 = scalar_select %p137_p4, %s2149_s19, %s3016_s3  }
  0x4a   : > { %s2402_s17 = scalar_select %p64_p6, %s2173_s24, %s66_s5  }
  0x4b   : > { %s1649_s4 = sshll.u32 %s2189_s28, 8  ;;  %s196_s26 = scalar_lea.vmem [#allocation4], %s1628_s20 }
  0x4c   : > { %s203_s9 = sadd.s32 %s1649_s4, %s1630_s15  ;;  %s206_s25 = sshll.u32 %s196_s26, 4  ;;  %s2405_s25 = int_to_ptr.vmem [resolvable:$true] %s206_s25 }
  0x4d   : > { %s1632_s18 = sshll.u32 %s203_s9, 7  ;;  %p2416_p7 = pnand %p2994_p2, %p2384_p13 }
  0x4e   : > { %s2410_s23 = scalar_lea.hbm %s2972_s1, %s1632_s18  ;;  %s2420_s4 = scalar_lea.sflag [#allocation5], %s192_s12 }
  0x4f   : > { %s1979_s26 = scalar_lea.hbm %s2410_s23, 16384  ;;  %p1981_p10 = pneg %p2416_p7 }
  0x50   : > { %p1980_p8 = scmp.ne.s32.totalorder %s2410_s23, %s1979_s26  ;;  %s1984_s8 = scalar_lea.hbm %s2972_s1, 65536 }
  0x51   : > { %p1985_p1 = scmp.lt.u32.totalorder %s2410_s23, %s2972_s1  ;;  %p1986_p3 = scmp.lt.u32.totalorder %s1984_s8, %s1979_s26 }
  0x52   : > { %p1982_p12 = pnand %p1981_p10, %p1980_p8  ;;  %p1988_p13 = scmp.lt.u32.totalorder %s1979_s26, %s2410_s23 }
  0x53   : > { %p1987_p9 = por %p1986_p3, %p1985_p1 }
  0x54   : > { %p1983_p0 = pneg %p1982_p12 }
  0x55   : > { %p1989_p4 = por %p1988_p13, %p1987_p9 }
  0x57   : > { %p1990_p6 = pnand %p1989_p4, %p1983_p0 }
  0x59   : > { %1993 = shalt.err (!%p1990_p6)
}
  0x5a   : > { %s1994_s13 = scalar_lea.vmem %s2405_s25, 16384  ;;  %s2198_s12 = smov [#allocation4]  }
  0x5b   : > { %p1995_p8 = scmp.ne.s32.totalorder %s2405_s25, %s1994_s13  ;;  %s1999_s15 = sshll.u32 %s2198_s12, 4  ;;  %s2000_s15 = int_to_ptr.vmem [resolvable:$false] %s1999_s15 }
  0x5c   : > { %s2001_s6 = scalar_lea.vmem %s2000_s15, 32768  ;;  %p2002_p5 = scmp.lt.s32.totalorder %s2405_s25, %s2000_s15 }
  0x5d   : > { %p1997_p12 = pnand %p1995_p8, %p1981_p10  ;;  %p2003_p1 = scmp.lt.s32.totalorder %s2001_s6, %s1994_s13 }
  0x5f   : > { %p1998_p2 = pneg %p1997_p12  ;;  %p2004_p3 = por %p2003_p1, %p2002_p5 }
  0x61   : > { %p2005_p9 = pnand %p2004_p3, %p1998_p2 }
  0x63   : > { %2008 = shalt.err (!%p2005_p9)
}
  0x64   : > { %s2199_s16 = smov 1024   ;;  %s2200_s20 = smov 512  }
  0x65   : > { %s2201_s26 = smov 32   ;;  %s216_s18 = sand.u32 1, %s2193_s29  }
  0x66   : > { %1814 = dma.hbm_to_vmem [thread:$0]  (!%p2416_p7), %s2410_s23, 16384, %s2405_s25, %s2420_s4, %s2199_s16, %s2200_s20, %s2201_s26  }
  0x67   : > { %s92_s30 = sadd.s32 1, %s2161_s22  ;;  %p99_p5 = scmp.ne.s32.totalorder %s2161_s22, %s2157_s21 }
  0x68   : > { %s2455_s8 = scalar_select %p90_p11, %s2161_s22, %s92_s30  }
  0x69   : > { %p3018_p2 = scmp.eq.s32.totalorder %s2193_s29, 0  ;;  %s218_s9 = sand.u32 1, %s2161_s22  }
  0x6a   : > { %s1633_s5 = sshll.u32 %s218_s9, 9  ;;  %s1650_s13 = sshll.u32 %s2185_s27, 13 }
  0x6b   : > { %p101_p10 = por %p99_p5, %p3018_p2  ;;  %s2464_s6 = scalar_lea.hbm %s2973_s2, %s1650_s13 }
  0x6c   : > { %s220_s25 = scalar_lea.vmem [#allocation7], %s1633_s5  ;;  %p3019_p7 = scmp.lt.s32.totalorder %s2193_s29, 4 }
  0x6d   : > { %s227_s23 = sshll.u32 %s220_s25, 4  ;;  %s2474_s3 = scalar_lea.sflag [#allocation8], %s216_s18  ;;  %s2472_s23 = int_to_ptr.vmem [resolvable:$true] %s227_s23 }
  0x6e   : > { %p2468_p0 = pnand %p3019_p7, %p101_p10  ;;  %s2009_s4 = scalar_lea.hbm %s2464_s6, 8192 }
  0x6f   : > { %p2010_p11 = scmp.ne.s32.totalorder %s2464_s6, %s2009_s4  ;;  %s2014_s26 = scalar_lea.hbm %s2973_s2, 16384 }
  0x70   : > { %p2011_p13 = pneg %p2468_p0  ;;  %p2015_p8 = scmp.lt.u32.totalorder %s2464_s6, %s2973_s2 }
  0x71   : > { %p2016_p12 = scmp.lt.u32.totalorder %s2014_s26, %s2009_s4  ;;  %p2018_p3 = scmp.lt.u32.totalorder %s2009_s4, %s2464_s6 }
  0x72   : > { %p2012_p4 = pnand %p2011_p13, %p2010_p11 }
  0x73   : > { %p2017_p1 = por %p2016_p12, %p2015_p8 }
  0x74   : > { %p2013_p6 = pneg %p2012_p4 }
  0x75   : > { %p2019_p9 = por %p2018_p3, %p2017_p1 }
  0x77   : > { %p2020_p5 = pnand %p2019_p9, %p2013_p6 }
  0x79   : > { %2023 = shalt.err (!%p2020_p5)
}
  0x7a   : > { %s2024_s18 = scalar_lea.vmem %s2472_s23, 8192  ;;  %s2202_s5 = smov [#allocation7]  }
  0x7b   : > { %p2025_p2 = scmp.ne.s32.totalorder %s2472_s23, %s2024_s18  ;;  %s2029_s13 = sshll.u32 %s2202_s5, 4  ;;  %s2030_s13 = int_to_ptr.vmem [resolvable:$false] %s2029_s13 }
  0x7c   : > { %s2031_s12 = scalar_lea.vmem %s2030_s13, 16384  ;;  %p2032_p11 = scmp.lt.s32.totalorder %s2472_s23, %s2030_s13 }
  0x7d   : > { %p2027_p10 = pnand %p2025_p2, %p2011_p13  ;;  %p2033_p4 = scmp.lt.s32.totalorder %s2031_s12, %s2024_s18 }
  0x7f   : > { %p2028_p7 = pneg %p2027_p10  ;;  %p2034_p8 = por %p2033_p4, %p2032_p11 }
  0x81   : > { %p2035_p12 = pnand %p2034_p8, %p2028_p7 }
  0x83   : > { %2038 = shalt.err (!%p2035_p12)
}
  0x84   : > { %s2203_s15 = smov 128   ;;  %s2204_s25 = smov 8  }
  0x85   : > { %1817 = dma.hbm_to_vmem [thread:$0]  (!%p2468_p0), %s2464_s6, 8192, %s2472_s23, %s2474_s3, %s2203_s15, %s2203_s15, %s2204_s25  }
  0x86   : > { %p3021_p13 = scmp.ne.s32.totalorder %s3010_s11, 0 }
  0x87   : > { %s241_s4 = sand.u32 (!%p3021_p13), 1, %s2169_s0   ;;  %p3022_p6 = scmp.ne.s32.totalorder (!%p3021_p13), %s3003_s7, 0 }
  0x88   : > { %239 = sbr.rel (%p3021_p13) target bundleno = 890 (0x37a), region = 36  ;;  %s1637_s16 = sshll.u32 (!%p3021_p13), %s241_s4, 10 }
  0x89   : > { %s242_s20 = scalar_lea.sflag (!%p3021_p13), [#allocation5], %s241_s4  ;;  %s2505_s26 = scalar_lea.vmem (!%p3021_p13), [#allocation4], %s1637_s16 }
  0x8f   : > { %2124 = dma.done.wait (%p3022_p6), %s242_s20, 16384  }
  0x90   : > { %2126 = vsyncadd (%p3022_p6), %s242_s20, 4294950912  ;;  %s3023_s30 = sld [smem:[#allocation19_spill]]  ;;  %s3024_s9 = sld [smem:[#allocation20_spill]] }
  0x91   : > { %s252_s6 = sand.u32 1, %s2157_s21  }
  0x92   : > { %s1638_s23 = sshll.u32 %s252_s6, 9 }
  0x93   : > { %s2513_s3 = scalar_lea.vmem [#allocation7], %s1638_s23 }
  0x96   : > { %s250_s14 = sand.u32 1, %s3023_s30   ;;  %p3025_p0 = scmp.ne.s32.totalorder %s3024_s9, 0 }
  0x97   : > { %s251_s11 = scalar_lea.sflag [#allocation8], %s250_s14 }
  0x98   : > { %2128 = dma.done.wait (%p3025_p0), %s251_s11, 8192  }
  0x99   : > { %2130 = vsyncadd (%p3025_p0), %s251_s11, 4294959104  ;;  %p3026_p1 = scmp.eq.s32.totalorder %s3023_s30, 0 }
  0x9b   : > { %2132 = dma.done.wait (%p3026_p1), [#allocation8], 4096   ;;  %p3027_p3 = pmov %p3026_p1 }
  0x9c   : > { %s3028_s7 = sld [smem:[#allocation16_spill]]  ;;  %s3029_s12 = sld [smem:[#allocation17_spill]] }
  0x9d   : > { %2134 = vsyncadd (%p3027_p3), [#allocation8], 4294963200 }
  0xa2   : > { %s285_s18 = sand.u32 1, %s3028_s7   ;;  %p1641_p9 = scmp.ne.s32.totalorder %s3029_s12, 0 }
  0xa3   : > { %s1640_s5 = sshll.u32 %s285_s18, 9  ;;  %v2205_v0 = vmov (!%p1641_p9), 0.0  }
  0xa4   : > { %s2526_s13 = scalar_lea.vmem [#allocation10], %s1640_s5  ;;  %295 = sbr.rel (%p1641_p9) target bundleno = 180 (0xb4), region = 52  ;;  %296 = vst [vmem:[#allocation2] sm:$0xff] (!%p1641_p9), %v2205_v0  ;;  %297 = vst [vmem:[#allocation2 + $0x8] sm:$0xff] (!%p1641_p9), %v2205_v0 }
  0xa5   : > { %298 = vst [vmem:[#allocation2 + $0x10] sm:$0xff] (!%p1641_p9), %v2205_v0  ;;  %299 = vst [vmem:[#allocation2 + $0x18] sm:$0xff] (!%p1641_p9), %v2205_v0 }
  0xa6   : > { %300 = vst [vmem:[#allocation2 + $0x20] sm:$0xff] (!%p1641_p9), %v2205_v0  ;;  %301 = vst [vmem:[#allocation2 + $0x28] sm:$0xff] (!%p1641_p9), %v2205_v0 }
  0xa7   : > { %302 = vst [vmem:[#allocation2 + $0x30] sm:$0xff] (!%p1641_p9), %v2205_v0  ;;  %303 = vst [vmem:[#allocation2 + $0x38] sm:$0xff] (!%p1641_p9), %v2205_v0 }
  0xa8   : > { %304 = vst [vmem:[#allocation2 + $0x40] sm:$0xff] (!%p1641_p9), %v2205_v0  ;;  %305 = vst [vmem:[#allocation2 + $0x48] sm:$0xff] (!%p1641_p9), %v2205_v0 }
  0xa9   : > { %306 = vst [vmem:[#allocation2 + $0x50] sm:$0xff] (!%p1641_p9), %v2205_v0  ;;  %307 = vst [vmem:[#allocation2 + $0x58] sm:$0xff] (!%p1641_p9), %v2205_v0 }
  0xaa   : > { %308 = vst [vmem:[#allocation2 + $0x60] sm:$0xff] (!%p1641_p9), %v2205_v0  ;;  %309 = vst [vmem:[#allocation2 + $0x68] sm:$0xff] (!%p1641_p9), %v2205_v0 }
  0xab   : > { %310 = vst [vmem:[#allocation2 + $0x70] sm:$0xff] %v2205_v0  ;;  %311 = vst [vmem:[#allocation2 + $0x78] sm:$0xff] %v2205_v0 }
  0xac   : > { %312 = vst [vmem:[#allocation2 + $0x80] sm:$0xff] %v2205_v0  ;;  %313 = vst [vmem:[#allocation2 + $0x88] sm:$0xff] %v2205_v0 }
  0xad   : > { %314 = vst [vmem:[#allocation2 + $0x90] sm:$0xff] %v2205_v0  ;;  %315 = vst [vmem:[#allocation2 + $0x98] sm:$0xff] %v2205_v0 }
  0xae   : > { %316 = vst [vmem:[#allocation2 + $0xa0] sm:$0xff] %v2205_v0  ;;  %317 = vst [vmem:[#allocation2 + $0xa8] sm:$0xff] %v2205_v0 }
  0xaf   : > { %318 = vst [vmem:[#allocation2 + $0xb0] sm:$0xff] %v2205_v0  ;;  %319 = vst [vmem:[#allocation2 + $0xb8] sm:$0xff] %v2205_v0 }
  0xb0   : > { %320 = vst [vmem:[#allocation2 + $0xc0] sm:$0xff] %v2205_v0  ;;  %321 = vst [vmem:[#allocation2 + $0xc8] sm:$0xff] %v2205_v0 }
  0xb1   : > { %322 = vst [vmem:[#allocation2 + $0xd0] sm:$0xff] %v2205_v0  ;;  %323 = vst [vmem:[#allocation2 + $0xd8] sm:$0xff] %v2205_v0 }
  0xb2   : > { %324 = vst [vmem:[#allocation2 + $0xe0] sm:$0xff] %v2205_v0  ;;  %325 = vst [vmem:[#allocation2 + $0xe8] sm:$0xff] %v2205_v0 }
  0xb3   : > { %326 = vst [vmem:[#allocation2 + $0xf0] sm:$0xff] %v2205_v0  ;;  %327 = vst [vmem:[#allocation2 + $0xf8] sm:$0xff] %v2205_v0 }
  0xb4 PF: > { %v488_v1 = vld [vmem:[%s2513_s3] sm:$0xff]  ;;  %v489_v2 = vld [vmem:[%s2513_s3 + $0x8] sm:$0xff]  ;;  %v2206_v4 = vmov 0.0|0.0   ;;  %v490_v7 = vld [vmem:[%s2513_s3 + $0x10] sm:$0xff]  ;;  %s3030_s15 = sld [smem:[#allocation17_spill]] }
  0xb5   : > { %v520_v3 = vld [vmem:[%s2513_s3 + $0x100] sm:$0xff]  ;;  %1653 = vmatprep.subr.bf16.mxu0 %v2206_v4  ;;  %1701 = vmatprep.subr.bf16.mxu1 %v2206_v4  ;;  %v1654_v5 = vpack.c.bf16 %v489_v2, %v488_v1  ;;  %v521_v6 = vld [vmem:[%s2513_s3 + $0x108] sm:$0xff]  ;;  %v491_v8 = vld [vmem:[%s2513_s3 + $0x18] sm:$0xff] }
  0xb6   : > { %v1702_v9 = vpack.c.bf16 %v521_v6, %v520_v3  ;;  %v522_v10 = vld [vmem:[%s2513_s3 + $0x110] sm:$0xff]  ;;  %v523_v11 = vld [vmem:[%s2513_s3 + $0x118] sm:$0xff]  ;;  %v1657_v12 = vpack.c.bf16 %v491_v8, %v490_v7  ;;  %v492_v14 = vld [vmem:[%s2513_s3 + $0x20] sm:$0xff] }
  0xb7   : > { %1655 = vmatpush1.bf16.msra.mxu0 %v1654_v5  ;;  %v1705_v13 = vpack.c.bf16 %v523_v11, %v522_v10  ;;  %v493_v15 = vld [vmem:[%s2513_s3 + $0x28] sm:$0xff]  ;;  %v524_v16 = vld [vmem:[%s2513_s3 + $0x120] sm:$0xff]  ;;  %v494_v20 = vld [vmem:[%s2513_s3 + $0x30] sm:$0xff] }
  0xb8   : > { %1703 = vmatpush1.bf16.msra.mxu1 %v1702_v9  ;;  %1656 = vmatprep.subr.bf16.mxu0 %v2206_v4  ;;  %v525_v17 = vld [vmem:[%s2513_s3 + $0x128] sm:$0xff]  ;;  %v1660_v18 = vpack.c.bf16 %v493_v15, %v492_v14  ;;  %v495_v21 = vld [vmem:[%s2513_s3 + $0x38] sm:$0xff]  ;;  %v526_v22 = vld [vmem:[%s2513_s3 + $0x130] sm:$0xff] }
  0xb9   : > { %1704 = vmatprep.subr.bf16.mxu1 %v2206_v4  ;;  %v1708_v19 = vpack.c.bf16 %v525_v17, %v524_v16  ;;  %v527_v23 = vld [vmem:[%s2513_s3 + $0x138] sm:$0xff]  ;;  %v1663_v24 = vpack.c.bf16 %v495_v21, %v494_v20  ;;  %v496_v26 = vld [vmem:[%s2513_s3 + $0x40] sm:$0xff]  ;;  %v497_v27 = vld [vmem:[%s2513_s3 + $0x48] sm:$0xff] }
  0xba   : > { %v1711_v25 = vpack.c.bf16 %v527_v23, %v526_v22  ;;  %v528_v28 = vld [vmem:[%s2513_s3 + $0x140] sm:$0xff]  ;;  %v529_v29 = vld [vmem:[%s2513_s3 + $0x148] sm:$0xff]  ;;  %v1666_v30 = vpack.c.bf16 %v497_v27, %v496_v26  ;;  %v498_v32 = vld [vmem:[%s2513_s3 + $0x50] sm:$0xff]  ;;  %p1642_p5 = scmp.ne.s32.totalorder %s3030_s15, 1 }
  0xbb   : > { %1658 = vmatpush1.bf16.msra.mxu0 %v1657_v12  ;;  %v1714_v31 = vpack.c.bf16 %v529_v29, %v528_v28  ;;  %v499_v33 = vld [vmem:[%s2513_s3 + $0x58] sm:$0xff]  ;;  %v530_v34 = vld [vmem:[%s2513_s3 + $0x150] sm:$0xff]  ;;  %v500_v38 = vld [vmem:[%s2513_s3 + $0x60] sm:$0xff]  ;;  %s1070_s25 = sld [smem:[#allocation3]] (!%p1642_p5) }
  0xbc   : > { %1706 = vmatpush1.bf16.msra.mxu1 %v1705_v13  ;;  %1659 = vmatprep.subr.bf16.mxu0 %v2206_v4  ;;  %v531_v35 = vld [vmem:[%s2513_s3 + $0x158] sm:$0xff]  ;;  %v1669_v36 = vpack.c.bf16 %v499_v33, %v498_v32  ;;  %v501_v39 = vld [vmem:[%s2513_s3 + $0x68] sm:$0xff]  ;;  %v532_v40 = vld [vmem:[%s2513_s3 + $0x160] sm:$0xff] }
  0xbd   : > { %1707 = vmatprep.subr.bf16.mxu1 %v2206_v4  ;;  %v1717_v37 = vpack.c.bf16 %v531_v35, %v530_v34  ;;  %v533_v41 = vld [vmem:[%s2513_s3 + $0x168] sm:$0xff]  ;;  %v363_v43 = vld [vmem:[%s2505_s26 + $0x18] sm:$0xff]  ;;  %v1672_v44 = vpack.c.bf16 %v501_v39, %v500_v38  ;;  %v502_v46 = vld [vmem:[%s2513_s3 + $0x70] sm:$0xff] }
  0xbe   : > { %v361_v42 = vld [vmem:[%s2505_s26 + $0x8] sm:$0xff]  ;;  %841 = vmatprep.mubr.f32.mxu1 %v363_v43  ;;  %v1720_v45 = vpack.c.bf16 %v533_v41, %v532_v40  ;;  %v503_v47 = vld [vmem:[%s2513_s3 + $0x78] sm:$0xff]  ;;  %v534_v48 = vld [vmem:[%s2513_s3 + $0x170] sm:$0xff] }
  0xbf   : > { %1661 = vmatpush1.bf16.msra.mxu0 %v1660_v18  ;;  %616 = vmatprep.mubr.f32.mxu0 %v361_v42  ;;  %v535_v49 = vld [vmem:[%s2513_s3 + $0x178] sm:$0xff]  ;;  %v1675_v50 = vpack.c.bf16 %v503_v47, %v502_v46  ;;  %v504_v52 = vld [vmem:[%s2513_s3 + $0x80] sm:$0xff]  ;;  %v505_v53 = vld [vmem:[%s2513_s3 + $0x88] sm:$0xff] }
  0xc0   : > { %1709 = vmatpush1.bf16.msra.mxu1 %v1708_v19  ;;  %1662 = vmatprep.subr.bf16.mxu0 %v2206_v4  ;;  %v1723_v51 = vpack.c.bf16 %v535_v49, %v534_v48  ;;  %v536_v54 = vld [vmem:[%s2513_s3 + $0x180] sm:$0xff]  ;;  %v537_v55 = vld [vmem:[%s2513_s3 + $0x188] sm:$0xff]  ;;  %v1678_v56 = vpack.c.bf16 %v505_v53, %v504_v52  ;;  %v506_v58 = vld [vmem:[%s2513_s3 + $0x90] sm:$0xff] }
  0xc1   : > { %1710 = vmatprep.subr.bf16.mxu1 %v2206_v4  ;;  %v1726_v57 = vpack.c.bf16 %v537_v55, %v536_v54  ;;  %v507_v59 = vld [vmem:[%s2513_s3 + $0x98] sm:$0xff]  ;;  %v538_v60 = vld [vmem:[%s2513_s3 + $0x190] sm:$0xff]  ;;  %v508_v0 = vld [vmem:[%s2513_s3 + $0xa0] sm:$0xff] }
  0xc2   : > { %v539_v61 = vld [vmem:[%s2513_s3 + $0x198] sm:$0xff]  ;;  %v1681_v62 = vpack.c.bf16 %v507_v59, %v506_v58  ;;  %v509_v1 = vld [vmem:[%s2513_s3 + $0xa8] sm:$0xff]  ;;  %v540_v2 = vld [vmem:[%s2513_s3 + $0x1a0] sm:$0xff] }
  0xc3   : > { %1664 = vmatpush1.bf16.msra.mxu0 %v1663_v24  ;;  %v1729_v63 = vpack.c.bf16 %v539_v61, %v538_v60  ;;  %v541_v3 = vld [vmem:[%s2513_s3 + $0x1a8] sm:$0xff]  ;;  %v1684_v5 = vpack.c.bf16 %v509_v1, %v508_v0  ;;  %v510_v7 = vld [vmem:[%s2513_s3 + $0xb0] sm:$0xff]  ;;  %v511_v8 = vld [vmem:[%s2513_s3 + $0xb8] sm:$0xff] }
  0xc4   : > { %1712 = vmatpush1.bf16.msra.mxu1 %v1711_v25  ;;  %1665 = vmatprep.subr.bf16.mxu0 %v2206_v4  ;;  %v1732_v6 = vpack.c.bf16 %v541_v3, %v540_v2  ;;  %v542_v9 = vld [vmem:[%s2513_s3 + $0x1b0] sm:$0xff]  ;;  %v543_v10 = vld [vmem:[%s2513_s3 + $0x1b8] sm:$0xff]  ;;  %v1687_v11 = vpack.c.bf16 %v511_v8, %v510_v7  ;;  %v512_v13 = vld [vmem:[%s2513_s3 + $0xc0] sm:$0xff] }
  0xc5   : > { %1713 = vmatprep.subr.bf16.mxu1 %v2206_v4  ;;  %v1735_v12 = vpack.c.bf16 %v543_v10, %v542_v9  ;;  %v513_v14 = vld [vmem:[%s2513_s3 + $0xc8] sm:$0xff]  ;;  %v544_v15 = vld [vmem:[%s2513_s3 + $0x1c0] sm:$0xff]  ;;  %v514_v19 = vld [vmem:[%s2513_s3 + $0xd0] sm:$0xff] }
  0xc6   : > { %v545_v16 = vld [vmem:[%s2513_s3 + $0x1c8] sm:$0xff]  ;;  %v1690_v17 = vpack.c.bf16 %v513_v14, %v512_v13  ;;  %v515_v20 = vld [vmem:[%s2513_s3 + $0xd8] sm:$0xff]  ;;  %v546_v21 = vld [vmem:[%s2513_s3 + $0x1d0] sm:$0xff] }
  0xc7   : > { %1667 = vmatpush1.bf16.msra.mxu0 %v1666_v30  ;;  %v1738_v18 = vpack.c.bf16 %v545_v16, %v544_v15  ;;  %v547_v22 = vld [vmem:[%s2513_s3 + $0x1d8] sm:$0xff]  ;;  %v1693_v23 = vpack.c.bf16 %v515_v20, %v514_v19  ;;  %v516_v25 = vld [vmem:[%s2513_s3 + $0xe0] sm:$0xff]  ;;  %v517_v26 = vld [vmem:[%s2513_s3 + $0xe8] sm:$0xff] }
  0xc8   : > { %1715 = vmatpush1.bf16.msra.mxu1 %v1714_v31  ;;  %1668 = vmatprep.subr.bf16.mxu0 %v2206_v4  ;;  %v1741_v24 = vpack.c.bf16 %v547_v22, %v546_v21  ;;  %v548_v27 = vld [vmem:[%s2513_s3 + $0x1e0] sm:$0xff]  ;;  %v549_v28 = vld [vmem:[%s2513_s3 + $0x1e8] sm:$0xff]  ;;  %v1696_v29 = vpack.c.bf16 %v517_v26, %v516_v25  ;;  %v518_v31 = vld [vmem:[%s2513_s3 + $0xf0] sm:$0xff] }
  0xc9   : > { %1716 = vmatprep.subr.bf16.mxu1 %v2206_v4  ;;  %v1744_v30 = vpack.c.bf16 %v549_v28, %v548_v27  ;;  %v519_v32 = vld [vmem:[%s2513_s3 + $0xf8] sm:$0xff]  ;;  %v550_v33 = vld [vmem:[%s2513_s3 + $0x1f0] sm:$0xff]  ;;  %v365_v39 = vld [vmem:[%s2505_s26 + $0x28] sm:$0xff] }
  0xca   : > { %v551_v34 = vld [vmem:[%s2513_s3 + $0x1f8] sm:$0xff]  ;;  %v1699_v35 = vpack.c.bf16 %v519_v32, %v518_v31  ;;  %v362_v38 = vld [vmem:[%s2505_s26 + $0x10] sm:$0xff]  ;;  %v364_v41 = vld [vmem:[%s2505_s26 + $0x20] sm:$0xff] }
  0xcb   : > { %1670 = vmatpush1.bf16.msra.mxu0 %v1669_v36  ;;  %v1747_v36 = vpack.c.bf16 %v551_v34, %v550_v33  ;;  %v367_v40 = vld [vmem:[%s2505_s26 + $0x38] sm:$0xff]  ;;  %v366_v42 = vld [vmem:[%s2505_s26 + $0x30] sm:$0xff]  ;;  %v369_v43 = vld [vmem:[%s2505_s26 + $0x48] sm:$0xff] }
  0xcc   : > { %1718 = vmatpush1.bf16.msra.mxu1 %v1717_v37  ;;  %1671 = vmatprep.subr.bf16.mxu0 %v2206_v4  ;;  %v360_v37 = vld [vmem:[%s2505_s26] sm:$0xff]  ;;  %v373_v46 = vld [vmem:[%s2505_s26 + $0x68] sm:$0xff]  ;;  %v375_v47 = vld [vmem:[%s2505_s26 + $0x78] sm:$0xff] }
  0xcd   : > { %1719 = vmatprep.subr.bf16.mxu1 %v2206_v4  ;;  %v372_v48 = vld [vmem:[%s2505_s26 + $0x60] sm:$0xff]  ;;  %v374_v49 = vld [vmem:[%s2505_s26 + $0x70] sm:$0xff]  ;;  %v381_v54 = vld [vmem:[%s2505_s26 + $0xa8] sm:$0xff] }
  0xce   : > { %v376_v52 = vld [vmem:[%s2505_s26 + $0x80] sm:$0xff]  ;;  %v378_v53 = vld [vmem:[%s2505_s26 + $0x90] sm:$0xff]  ;;  %v383_v55 = vld [vmem:[%s2505_s26 + $0xb8] sm:$0xff] }
  0xcf   : > { %1673 = vmatpush1.bf16.msra.mxu0 %v1672_v44  ;;  %v368_v44 = vld [vmem:[%s2505_s26 + $0x40] sm:$0xff]  ;;  %v385_v58 = vld [vmem:[%s2505_s26 + $0xc8] sm:$0xff]  ;;  %v387_v59 = vld [vmem:[%s2505_s26 + $0xd8] sm:$0xff] }
  0xd0   : > { %1721 = vmatpush1.bf16.msra.mxu1 %v1720_v45  ;;  %1674 = vmatprep.subr.bf16.mxu0 %v2206_v4  ;;  %v370_v45 = vld [vmem:[%s2505_s26 + $0x50] sm:$0xff]  ;;  %v384_v60 = vld [vmem:[%s2505_s26 + $0xc0] sm:$0xff]  ;;  %v393_v2 = vld [vmem:[%s2505_s26 + $0x108] sm:$0xff] }
  0xd1   : > { %1722 = vmatprep.subr.bf16.mxu1 %v2206_v4  ;;  %v386_v61 = vld [vmem:[%s2505_s26 + $0xd0] sm:$0xff]  ;;  %v388_v0 = vld [vmem:[%s2505_s26 + $0xe0] sm:$0xff]  ;;  %v395_v3 = vld [vmem:[%s2505_s26 + $0x118] sm:$0xff] }
  0xd2   : > { %v390_v1 = vld [vmem:[%s2505_s26 + $0xf0] sm:$0xff]  ;;  %v397_v7 = vld [vmem:[%s2505_s26 + $0x128] sm:$0xff]  ;;  %v399_v8 = vld [vmem:[%s2505_s26 + $0x138] sm:$0xff] }
  0xd3   : > { %1676 = vmatpush1.bf16.msra.mxu0 %v1675_v50  ;;  %v377_v50 = vld [vmem:[%s2505_s26 + $0x88] sm:$0xff]  ;;  %v396_v9 = vld [vmem:[%s2505_s26 + $0x120] sm:$0xff]  ;;  %v398_v10 = vld [vmem:[%s2505_s26 + $0x130] sm:$0xff] }
  0xd4   : > { %1724 = vmatpush1.bf16.msra.mxu1 %v1723_v51  ;;  %1677 = vmatprep.subr.bf16.mxu0 %v2206_v4  ;;  %v379_v51 = vld [vmem:[%s2505_s26 + $0x98] sm:$0xff]  ;;  %v400_v13 = vld [vmem:[%s2505_s26 + $0x140] sm:$0xff]  ;;  %v402_v14 = vld [vmem:[%s2505_s26 + $0x150] sm:$0xff] }
  0xd5   : > { %1725 = vmatprep.subr.bf16.mxu1 %v2206_v4  ;;  %v405_v15 = vld [vmem:[%s2505_s26 + $0x168] sm:$0xff]  ;;  %v407_v16 = vld [vmem:[%s2505_s26 + $0x178] sm:$0xff]  ;;  %v408_v21 = vld [vmem:[%s2505_s26 + $0x180] sm:$0xff] }
  0xd6   : > { %v409_v19 = vld [vmem:[%s2505_s26 + $0x188] sm:$0xff]  ;;  %v411_v20 = vld [vmem:[%s2505_s26 + $0x198] sm:$0xff]  ;;  %v410_v22 = vld [vmem:[%s2505_s26 + $0x190] sm:$0xff] }
  0xd7   : > { %1679 = vmatpush1.bf16.msra.mxu0 %v1678_v56  ;;  %v380_v56 = vld [vmem:[%s2505_s26 + $0xa0] sm:$0xff]  ;;  %v414_v26 = vld [vmem:[%s2505_s26 + $0x1b0] sm:$0xff]  ;;  %v417_v27 = vld [vmem:[%s2505_s26 + $0x1c8] sm:$0xff] }
  0xd8   : > { %1727 = vmatpush1.bf16.msra.mxu1 %v1726_v57  ;;  %1680 = vmatprep.subr.bf16.mxu0 %v2206_v4  ;;  %v382_v57 = vld [vmem:[%s2505_s26 + $0xb0] sm:$0xff]  ;;  %v412_v25 = vld [vmem:[%s2505_s26 + $0x1a0] sm:$0xff]  ;;  %v419_v28 = vld [vmem:[%s2505_s26 + $0x1d8] sm:$0xff] }
  0xd9   : > { %1728 = vmatprep.subr.bf16.mxu1 %v2206_v4  ;;  %v421_v31 = vld [vmem:[%s2505_s26 + $0x1e8] sm:$0xff]  ;;  %v423_v32 = vld [vmem:[%s2505_s26 + $0x1f8] sm:$0xff]  ;;  %v420_v33 = vld [vmem:[%s2505_s26 + $0x1e0] sm:$0xff] }
  0xda   : > { %v422_v34 = vld [vmem:[%s2505_s26 + $0x1f0] sm:$0xff] }
  0xdb   : > { %1682 = vmatpush1.bf16.msra.mxu0 %v1681_v62  ;;  %v389_v62 = vld [vmem:[%s2505_s26 + $0xe8] sm:$0xff] }
  0xdc   : > { %1730 = vmatpush1.bf16.msra.mxu1 %v1729_v63  ;;  %1683 = vmatprep.subr.bf16.mxu0 %v2206_v4  ;;  %v391_v63 = vld [vmem:[%s2505_s26 + $0xf8] sm:$0xff] }
  0xdd   : > { %1731 = vmatprep.subr.bf16.mxu1 %v2206_v4 }
  0xdf   : > { %1685 = vmatpush1.bf16.msra.mxu0 %v1684_v5  ;;  %v392_v5 = vld [vmem:[%s2505_s26 + $0x100] sm:$0xff] }
  0xe0   : > { %1733 = vmatpush1.bf16.msra.mxu1 %v1732_v6  ;;  %1686 = vmatprep.subr.bf16.mxu0 %v2206_v4  ;;  %v394_v6 = vld [vmem:[%s2505_s26 + $0x110] sm:$0xff] }
  0xe1   : > { %1734 = vmatprep.subr.bf16.mxu1 %v2206_v4 }
  0xe3   : > { %1688 = vmatpush1.bf16.msra.mxu0 %v1687_v11  ;;  %v401_v11 = vld [vmem:[%s2505_s26 + $0x148] sm:$0xff] }
  0xe4   : > { %1736 = vmatpush1.bf16.msra.mxu1 %v1735_v12  ;;  %1689 = vmatprep.subr.bf16.mxu0 %v2206_v4  ;;  %v403_v12 = vld [vmem:[%s2505_s26 + $0x158] sm:$0xff] }
  0xe5   : > { %1737 = vmatprep.subr.bf16.mxu1 %v2206_v4 }
  0xe7   : > { %1691 = vmatpush1.bf16.msra.mxu0 %v1690_v17  ;;  %v404_v17 = vld [vmem:[%s2505_s26 + $0x160] sm:$0xff] }
  0xe8   : > { %1739 = vmatpush1.bf16.msra.mxu1 %v1738_v18  ;;  %1692 = vmatprep.subr.bf16.mxu0 %v2206_v4  ;;  %v406_v18 = vld [vmem:[%s2505_s26 + $0x170] sm:$0xff] }
  0xe9   : > { %1740 = vmatprep.subr.bf16.mxu1 %v2206_v4 }
  0xeb   : > { %1694 = vmatpush1.bf16.msra.mxu0 %v1693_v23  ;;  %v413_v23 = vld [vmem:[%s2505_s26 + $0x1a8] sm:$0xff] }
  0xec   : > { %1742 = vmatpush1.bf16.msra.mxu1 %v1741_v24  ;;  %1695 = vmatprep.subr.bf16.mxu0 %v2206_v4  ;;  %v415_v24 = vld [vmem:[%s2505_s26 + $0x1b8] sm:$0xff] }
  0xed   : > { %1743 = vmatprep.subr.bf16.mxu1 %v2206_v4 }
  0xef   : > { %1697 = vmatpush1.bf16.msra.mxu0 %v1696_v29  ;;  %v416_v29 = vld [vmem:[%s2505_s26 + $0x1c0] sm:$0xff] }
  0xf0   : > { %1745 = vmatpush1.bf16.msra.mxu1 %v1744_v30  ;;  %1698 = vmatprep.subr.bf16.mxu0 %v2206_v4  ;;  %v418_v30 = vld [vmem:[%s2505_s26 + $0x1d0] sm:$0xff] }
  0xf1   : > { %1746 = vmatprep.subr.bf16.mxu1 %v2206_v4  ;;  %v371_v4 = vld [vmem:[%s2505_s26 + $0x58] sm:$0xff] }
  0xf3   : > { %1700 = vmatpush1.bf16.msra.mxu0 %v1699_v35  ;;  %v425_v35 = vld [vmem:[%s2505_s26 + $0x208] sm:$0xff] }
  0xf4   : > { %1748 = vmatpush1.bf16.msra.mxu1 %v1747_v36  ;;  %v427_v36 = vld [vmem:[%s2505_s26 + $0x218] sm:$0xff] }
  0xf6   : > { %617 = vmatmul.mubr.f32.vlgmr.msra.gmra.mrb[0].mxu0 %v360_v37  ;;  %v424_v37 = vld [vmem:[%s2505_s26 + $0x200] sm:$0xff] }
  0xf7   : > { %842 = vmatmul.mubr.f32.vlgmr.msra.gmra.mrb[0].mxu1 %v362_v38  ;;  %621 = vmatprep.mubr.f32.mxu0 %v365_v39  ;;  %v426_v38 = vld [vmem:[%s2505_s26 + $0x210] sm:$0xff]  ;;  %v429_v39 = vld [vmem:[%s2505_s26 + $0x228] sm:$0xff] }
  0xf8   : > { %846 = vmatprep.mubr.f32.mxu1 %v367_v40  ;;  %v431_v40 = vld [vmem:[%s2505_s26 + $0x238] sm:$0xff] }
  0xfa   : > { %622 = vmatmul.mubr.f32.gmra.mrb[2].mxu0 %v364_v41  ;;  %v428_v41 = vld [vmem:[%s2505_s26 + $0x220] sm:$0xff] }
  0xfb   : > { %847 = vmatmul.mubr.f32.gmra.mrb[2].mxu1 %v366_v42  ;;  %626 = vmatprep.mubr.f32.mxu0 %v369_v43  ;;  %v430_v42 = vld [vmem:[%s2505_s26 + $0x230] sm:$0xff]  ;;  %v433_v43 = vld [vmem:[%s2505_s26 + $0x248] sm:$0xff] }
  0xfc   : > { %851 = vmatprep.mubr.f32.mxu1 %v371_v4  ;;  %v435_v4 = vld [vmem:[%s2505_s26 + $0x258] sm:$0xff] }
  0xfe   : > { %627 = vmatmul.mubr.f32.gmra.mrb[4].mxu0 %v368_v44  ;;  %v432_v44 = vld [vmem:[%s2505_s26 + $0x240] sm:$0xff] }
  0xff   : > { %852 = vmatmul.mubr.f32.gmra.mrb[4].mxu1 %v370_v45  ;;  %631 = vmatprep.mubr.f32.mxu0 %v373_v46  ;;  %v434_v45 = vld [vmem:[%s2505_s26 + $0x250] sm:$0xff]  ;;  %v437_v46 = vld [vmem:[%s2505_s26 + $0x268] sm:$0xff] }
 0x100   : > { %856 = vmatprep.mubr.f32.mxu1 %v375_v47  ;;  %v439_v47 = vld [vmem:[%s2505_s26 + $0x278] sm:$0xff] }
 0x102   : > { %632 = vmatmul.mubr.f32.gmra.mrb[6].mxu0 %v372_v48  ;;  %v436_v48 = vld [vmem:[%s2505_s26 + $0x260] sm:$0xff] }
 0x103   : > { %857 = vmatmul.mubr.f32.gmra.mrb[6].mxu1 %v374_v49  ;;  %636 = vmatprep.mubr.f32.mxu0 %v377_v50  ;;  %v438_v49 = vld [vmem:[%s2505_s26 + $0x270] sm:$0xff]  ;;  %v441_v50 = vld [vmem:[%s2505_s26 + $0x288] sm:$0xff] }
 0x104   : > { %861 = vmatprep.mubr.f32.mxu1 %v379_v51  ;;  %v443_v51 = vld [vmem:[%s2505_s26 + $0x298] sm:$0xff] }
 0x106   : > { %637 = vmatmul.mubr.f32.gmra.mrb[8].mxu0 %v376_v52  ;;  %v440_v52 = vld [vmem:[%s2505_s26 + $0x280] sm:$0xff] }
 0x107   : > { %862 = vmatmul.mubr.f32.gmra.mrb[8].mxu1 %v378_v53  ;;  %641 = vmatprep.mubr.f32.mxu0 %v381_v54  ;;  %v442_v53 = vld [vmem:[%s2505_s26 + $0x290] sm:$0xff]  ;;  %v445_v54 = vld [vmem:[%s2505_s26 + $0x2a8] sm:$0xff] }
 0x108   : > { %866 = vmatprep.mubr.f32.mxu1 %v383_v55  ;;  %v447_v55 = vld [vmem:[%s2505_s26 + $0x2b8] sm:$0xff] }
 0x10a   : > { %642 = vmatmul.mubr.f32.gmra.mrb[10].mxu0 %v380_v56  ;;  %v444_v56 = vld [vmem:[%s2505_s26 + $0x2a0] sm:$0xff] }
 0x10b   : > { %867 = vmatmul.mubr.f32.gmra.mrb[10].mxu1 %v382_v57  ;;  %646 = vmatprep.mubr.f32.mxu0 %v385_v58  ;;  %v446_v57 = vld [vmem:[%s2505_s26 + $0x2b0] sm:$0xff]  ;;  %v449_v58 = vld [vmem:[%s2505_s26 + $0x2c8] sm:$0xff] }
 0x10c   : > { %871 = vmatprep.mubr.f32.mxu1 %v387_v59  ;;  %v451_v59 = vld [vmem:[%s2505_s26 + $0x2d8] sm:$0xff] }
 0x10e   : > { %647 = vmatmul.mubr.f32.gmra.mrb[12].mxu0 %v384_v60  ;;  %v448_v60 = vld [vmem:[%s2505_s26 + $0x2c0] sm:$0xff] }
 0x10f   : > { %872 = vmatmul.mubr.f32.gmra.mrb[12].mxu1 %v386_v61  ;;  %651 = vmatprep.mubr.f32.mxu0 %v389_v62  ;;  %v450_v61 = vld [vmem:[%s2505_s26 + $0x2d0] sm:$0xff]  ;;  %v453_v62 = vld [vmem:[%s2505_s26 + $0x2e8] sm:$0xff] }
 0x110   : > { %876 = vmatprep.mubr.f32.mxu1 %v391_v63  ;;  %v455_v63 = vld [vmem:[%s2505_s26 + $0x2f8] sm:$0xff] }
 0x112   : > { %652 = vmatmul.mubr.f32.gmra.mrb[14].mxu0 %v388_v0  ;;  %v452_v0 = vld [vmem:[%s2505_s26 + $0x2e0] sm:$0xff] }
 0x113   : > { %877 = vmatmul.mubr.f32.gmra.mrb[14].mxu1 %v390_v1  ;;  %656 = vmatprep.mubr.f32.mxu0 %v393_v2  ;;  %v454_v1 = vld [vmem:[%s2505_s26 + $0x2f0] sm:$0xff]  ;;  %v457_v2 = vld [vmem:[%s2505_s26 + $0x308] sm:$0xff] }
 0x114   : > { %881 = vmatprep.mubr.f32.mxu1 %v395_v3  ;;  %v459_v3 = vld [vmem:[%s2505_s26 + $0x318] sm:$0xff] }
 0x116   : > { %657 = vmatmul.mubr.f32.gmra.mrb[16].mxu0 %v392_v5  ;;  %v456_v5 = vld [vmem:[%s2505_s26 + $0x300] sm:$0xff] }
 0x117   : > { %882 = vmatmul.mubr.f32.gmra.mrb[16].mxu1 %v394_v6  ;;  %661 = vmatprep.mubr.f32.mxu0 %v397_v7  ;;  %v458_v6 = vld [vmem:[%s2505_s26 + $0x310] sm:$0xff]  ;;  %v461_v7 = vld [vmem:[%s2505_s26 + $0x328] sm:$0xff] }
 0x118   : > { %886 = vmatprep.mubr.f32.mxu1 %v399_v8  ;;  %v463_v8 = vld [vmem:[%s2505_s26 + $0x338] sm:$0xff] }
 0x11a   : > { %662 = vmatmul.mubr.f32.gmra.mrb[18].mxu0 %v396_v9  ;;  %v460_v9 = vld [vmem:[%s2505_s26 + $0x320] sm:$0xff] }
 0x11b   : > { %887 = vmatmul.mubr.f32.gmra.mrb[18].mxu1 %v398_v10  ;;  %666 = vmatprep.mubr.f32.mxu0 %v401_v11  ;;  %v462_v10 = vld [vmem:[%s2505_s26 + $0x330] sm:$0xff]  ;;  %v465_v11 = vld [vmem:[%s2505_s26 + $0x348] sm:$0xff] }
 0x11c   : > { %891 = vmatprep.mubr.f32.mxu1 %v403_v12  ;;  %v467_v12 = vld [vmem:[%s2505_s26 + $0x358] sm:$0xff] }
 0x11e   : > { %667 = vmatmul.mubr.f32.gmra.mrb[20].mxu0 %v400_v13  ;;  %v464_v13 = vld [vmem:[%s2505_s26 + $0x340] sm:$0xff] }
 0x11f   : > { %892 = vmatmul.mubr.f32.gmra.mrb[20].mxu1 %v402_v14  ;;  %671 = vmatprep.mubr.f32.mxu0 %v405_v15  ;;  %v466_v14 = vld [vmem:[%s2505_s26 + $0x350] sm:$0xff]  ;;  %v469_v15 = vld [vmem:[%s2505_s26 + $0x368] sm:$0xff] }
 0x120   : > { %896 = vmatprep.mubr.f32.mxu1 %v407_v16  ;;  %v471_v16 = vld [vmem:[%s2505_s26 + $0x378] sm:$0xff] }
 0x122   : > { %672 = vmatmul.mubr.f32.gmra.mrb[22].mxu0 %v404_v17  ;;  %v468_v17 = vld [vmem:[%s2505_s26 + $0x360] sm:$0xff] }
 0x123   : > { %897 = vmatmul.mubr.f32.gmra.mrb[22].mxu1 %v406_v18  ;;  %676 = vmatprep.mubr.f32.mxu0 %v409_v19  ;;  %v470_v18 = vld [vmem:[%s2505_s26 + $0x370] sm:$0xff]  ;;  %v473_v19 = vld [vmem:[%s2505_s26 + $0x388] sm:$0xff] }
 0x124   : > { %901 = vmatprep.mubr.f32.mxu1 %v411_v20  ;;  %v475_v20 = vld [vmem:[%s2505_s26 + $0x398] sm:$0xff] }
 0x126   : > { %677 = vmatmul.mubr.f32.gmra.mrb[24].mxu0 %v408_v21  ;;  %v472_v21 = vld [vmem:[%s2505_s26 + $0x380] sm:$0xff] }
 0x127   : > { %902 = vmatmul.mubr.f32.gmra.mrb[24].mxu1 %v410_v22  ;;  %681 = vmatprep.mubr.f32.mxu0 %v413_v23  ;;  %v474_v22 = vld [vmem:[%s2505_s26 + $0x390] sm:$0xff]  ;;  %v477_v23 = vld [vmem:[%s2505_s26 + $0x3a8] sm:$0xff] }
 0x128   : > { %906 = vmatprep.mubr.f32.mxu1 %v415_v24  ;;  %v479_v24 = vld [vmem:[%s2505_s26 + $0x3b8] sm:$0xff] }
 0x12a   : > { %682 = vmatmul.mubr.f32.gmra.mrb[26].mxu0 %v412_v25  ;;  %v476_v25 = vld [vmem:[%s2505_s26 + $0x3a0] sm:$0xff] }
 0x12b   : > { %907 = vmatmul.mubr.f32.gmra.mrb[26].mxu1 %v414_v26  ;;  %686 = vmatprep.mubr.f32.mxu0 %v417_v27  ;;  %v478_v26 = vld [vmem:[%s2505_s26 + $0x3b0] sm:$0xff]  ;;  %v481_v27 = vld [vmem:[%s2505_s26 + $0x3c8] sm:$0xff] }
 0x12c   : > { %911 = vmatprep.mubr.f32.mxu1 %v419_v28  ;;  %v483_v28 = vld [vmem:[%s2505_s26 + $0x3d8] sm:$0xff] }
 0x12e   : > { %687 = vmatmul.mubr.f32.gmra.mrb[28].mxu0 %v416_v29  ;;  %v480_v29 = vld [vmem:[%s2505_s26 + $0x3c0] sm:$0xff] }
 0x12f   : > { %912 = vmatmul.mubr.f32.gmra.mrb[28].mxu1 %v418_v30  ;;  %691 = vmatprep.mubr.f32.mxu0 %v421_v31  ;;  %v482_v30 = vld [vmem:[%s2505_s26 + $0x3d0] sm:$0xff]  ;;  %v485_v31 = vld [vmem:[%s2505_s26 + $0x3e8] sm:$0xff] }
 0x130   : > { %916 = vmatprep.mubr.f32.mxu1 %v423_v32  ;;  %v487_v32 = vld [vmem:[%s2505_s26 + $0x3f8] sm:$0xff] }
 0x132   : > { %692 = vmatmul.mubr.f32.gmra.mrb[30].mxu0 %v420_v33  ;;  %v484_v33 = vld [vmem:[%s2505_s26 + $0x3e0] sm:$0xff] }
 0x133   : > { %917 = vmatmul.mubr.f32.gmra.mrb[30].mxu1 %v422_v34  ;;  %696 = vmatprep.mubr.f32.mxu0 %v425_v35  ;;  %v486_v34 = vld [vmem:[%s2505_s26 + $0x3f0] sm:$0xff] }
 0x134   : > { %921 = vmatprep.mubr.f32.mxu1 %v427_v36  ;;  %v328_v36 = vld [vmem:[#allocation2] sm:$0xff] }
 0x136   : > { %697 = vmatmul.mubr.f32.gmra.mrb[32].mxu0 %v424_v37 }
 0x137   : > { %922 = vmatmul.mubr.f32.gmra.mrb[32].mxu1 %v426_v38  ;;  %701 = vmatprep.mubr.f32.mxu0 %v429_v39 }
 0x138   : > { %926 = vmatprep.mubr.f32.mxu1 %v431_v40 }
 0x13a   : > { %702 = vmatmul.mubr.f32.gmra.mrb[34].mxu0 %v428_v41 }
 0x13b   : > { %927 = vmatmul.mubr.f32.gmra.mrb[34].mxu1 %v430_v42  ;;  %706 = vmatprep.mubr.f32.mxu0 %v433_v43  ;;  %v329_v43 = vld [vmem:[#allocation2 + $0x8] sm:$0xff] }
 0x13c   : > { %931 = vmatprep.mubr.f32.mxu1 %v435_v4 }
 0x13e   : > { %707 = vmatmul.mubr.f32.gmra.mrb[36].mxu0 %v432_v44 }
 0x13f   : > { %932 = vmatmul.mubr.f32.gmra.mrb[36].mxu1 %v434_v45  ;;  %711 = vmatprep.mubr.f32.mxu0 %v437_v46 }
 0x140   : > { %936 = vmatprep.mubr.f32.mxu1 %v439_v47 }
 0x142   : > { %712 = vmatmul.mubr.f32.gmra.mrb[38].mxu0 %v436_v48 }
 0x143   : > { %937 = vmatmul.mubr.f32.gmra.mrb[38].mxu1 %v438_v49  ;;  %716 = vmatprep.mubr.f32.mxu0 %v441_v50  ;;  %v330_v49 = vld [vmem:[#allocation2 + $0x10] sm:$0xff] }
 0x144   : > { %941 = vmatprep.mubr.f32.mxu1 %v443_v51 }
 0x146   : > { %717 = vmatmul.mubr.f32.gmra.mrb[40].mxu0 %v440_v52 }
 0x147   : > { %942 = vmatmul.mubr.f32.gmra.mrb[40].mxu1 %v442_v53  ;;  %721 = vmatprep.mubr.f32.mxu0 %v445_v54 }
 0x148   : > { %946 = vmatprep.mubr.f32.mxu1 %v447_v55 }
 0x14a   : > { %722 = vmatmul.mubr.f32.gmra.mrb[42].mxu0 %v444_v56  ;;  %v331_v56 = vld [vmem:[#allocation2 + $0x18] sm:$0xff] }
 0x14b   : > { %947 = vmatmul.mubr.f32.gmra.mrb[42].mxu1 %v446_v57  ;;  %726 = vmatprep.mubr.f32.mxu0 %v449_v58 }
 0x14c   : > { %951 = vmatprep.mubr.f32.mxu1 %v451_v59 }
 0x14e   : > { %727 = vmatmul.mubr.f32.gmra.mrb[44].mxu0 %v448_v60 }
 0x14f   : > { %952 = vmatmul.mubr.f32.gmra.mrb[44].mxu1 %v450_v61  ;;  %731 = vmatprep.mubr.f32.mxu0 %v453_v62 }
 0x150   : > { %956 = vmatprep.mubr.f32.mxu1 %v455_v63  ;;  %v332_v63 = vld [vmem:[#allocation2 + $0x20] sm:$0xff] }
 0x152   : > { %732 = vmatmul.mubr.f32.gmra.mrb[46].mxu0 %v452_v0 }
 0x153   : > { %957 = vmatmul.mubr.f32.gmra.mrb[46].mxu1 %v454_v1  ;;  %736 = vmatprep.mubr.f32.mxu0 %v457_v2 }
 0x154   : > { %961 = vmatprep.mubr.f32.mxu1 %v459_v3 }
 0x156   : > { %737 = vmatmul.mubr.f32.gmra.mrb[48].mxu0 %v456_v5 }
 0x157   : > { %962 = vmatmul.mubr.f32.gmra.mrb[48].mxu1 %v458_v6  ;;  %741 = vmatprep.mubr.f32.mxu0 %v461_v7  ;;  %v333_v7 = vld [vmem:[#allocation2 + $0x28] sm:$0xff] }
 0x158   : > { %966 = vmatprep.mubr.f32.mxu1 %v463_v8 }
 0x15a   : > { %742 = vmatmul.mubr.f32.gmra.mrb[50].mxu0 %v460_v9 }
 0x15b   : > { %967 = vmatmul.mubr.f32.gmra.mrb[50].mxu1 %v462_v10  ;;  %746 = vmatprep.mubr.f32.mxu0 %v465_v11 }
 0x15c   : > { %971 = vmatprep.mubr.f32.mxu1 %v467_v12 }
 0x15e   : > { %747 = vmatmul.mubr.f32.gmra.mrb[52].mxu0 %v464_v13 }
 0x15f   : > { %972 = vmatmul.mubr.f32.gmra.mrb[52].mxu1 %v466_v14  ;;  %751 = vmatprep.mubr.f32.mxu0 %v469_v15  ;;  %v334_v14 = vld [vmem:[#allocation2 + $0x30] sm:$0xff] }
 0x160   : > { %976 = vmatprep.mubr.f32.mxu1 %v471_v16 }
 0x162   : > { %752 = vmatmul.mubr.f32.gmra.mrb[54].mxu0 %v468_v17 }
 0x163   : > { %977 = vmatmul.mubr.f32.gmra.mrb[54].mxu1 %v470_v18  ;;  %756 = vmatprep.mubr.f32.mxu0 %v473_v19 }
 0x164   : > { %981 = vmatprep.mubr.f32.mxu1 %v475_v20 }
 0x166   : > { %757 = vmatmul.mubr.f32.gmra.mrb[56].mxu0 %v472_v21  ;;  %v335_v21 = vld [vmem:[#allocation2 + $0x38] sm:$0xff] }
 0x167   : > { %982 = vmatmul.mubr.f32.gmra.mrb[56].mxu1 %v474_v22  ;;  %761 = vmatprep.mubr.f32.mxu0 %v477_v23 }
 0x168   : > { %986 = vmatprep.mubr.f32.mxu1 %v479_v24 }
 0x16a   : > { %762 = vmatmul.mubr.f32.gmra.mrb[58].mxu0 %v476_v25 }
 0x16b   : > { %987 = vmatmul.mubr.f32.gmra.mrb[58].mxu1 %v478_v26  ;;  %766 = vmatprep.mubr.f32.mxu0 %v481_v27 }
 0x16c   : > { %991 = vmatprep.mubr.f32.mxu1 %v483_v28  ;;  %v336_v28 = vld [vmem:[#allocation2 + $0x40] sm:$0xff] }
 0x16e   : > { %767 = vmatmul.mubr.f32.gmra.mrb[60].mxu0 %v480_v29 }
 0x16f   : > { %992 = vmatmul.mubr.f32.gmra.mrb[60].mxu1 %v482_v30  ;;  %771 = vmatprep.mubr.f32.mxu0 %v485_v31 }
 0x170   : > { %996 = vmatprep.mubr.f32.mxu1 %v487_v32 }
 0x172   : > { %772 = vmatmul.mubr.f32.gmra.mrb[62].mxu0 %v484_v33 }
 0x173   : > { %997 = vmatmul.mubr.f32.gmra.mrb[62].mxu1 %v486_v34 }
 0x1c9   : > { %v618_v35 = vpop.f32.mrb[0].mxu0 }
 0x1ca   : > { %v843_v37 = vpop.f32.mrb[0].mxu1  ;;  %v620_v38 = vpop.f32.mrb[1].mxu0 }
 0x1cb   : > { %v844_v39 = vadd.f32 %v843_v37, %v618_v35  ;;  %v845_v40 = vpop.f32.mrb[1].mxu1  ;;  %v337_v35 = vld [vmem:[#allocation2 + $0x48] sm:$0xff] }
 0x1cd   : > { %v1002_v41 = vadd.f32 %v844_v39, %v328_v36  ;;  %v623_v42 = vpop.f32.mrb[2].mxu0 }
 0x1ce   : > { %v848_v4 = vpop.f32.mrb[2].mxu1  ;;  %v625_v44 = vpop.f32.mrb[3].mxu0 }
 0x1cf   : > { %1034 = vst [vmem:[#allocation2] sm:$0xff] %v1002_v41  ;;  %v849_v45 = vadd.f32 %v848_v4, %v623_v42  ;;  %v850_v46 = vpop.f32.mrb[3].mxu1  ;;  %v338_v42 = vld [vmem:[#allocation2 + $0x50] sm:$0xff] }
 0x1d1   : > { %v1003_v47 = vadd.f32 %v849_v45, %v329_v43  ;;  %v628_v48 = vpop.f32.mrb[4].mxu0 }
 0x1d2   : > { %v853_v50 = vpop.f32.mrb[4].mxu1  ;;  %v630_v51 = vpop.f32.mrb[5].mxu0 }
 0x1d3   : > { %1035 = vst [vmem:[#allocation2 + $0x8] sm:$0xff] %v1003_v47  ;;  %v854_v52 = vadd.f32 %v853_v50, %v628_v48  ;;  %v855_v53 = vpop.f32.mrb[5].mxu1  ;;  %v339_v48 = vld [vmem:[#allocation2 + $0x58] sm:$0xff] }
 0x1d5   : > { %v1004_v54 = vadd.f32 %v854_v52, %v330_v49  ;;  %v633_v55 = vpop.f32.mrb[6].mxu0 }
 0x1d6   : > { %v858_v57 = vpop.f32.mrb[6].mxu1  ;;  %v635_v58 = vpop.f32.mrb[7].mxu0 }
 0x1d7   : > { %1036 = vst [vmem:[#allocation2 + $0x10] sm:$0xff] %v1004_v54  ;;  %v859_v59 = vadd.f32 %v858_v57, %v633_v55  ;;  %v860_v60 = vpop.f32.mrb[7].mxu1  ;;  %v340_v55 = vld [vmem:[#allocation2 + $0x60] sm:$0xff] }
 0x1d9   : > { %v1005_v61 = vadd.f32 %v859_v59, %v331_v56  ;;  %v638_v62 = vpop.f32.mrb[8].mxu0 }
 0x1da   : > { %v863_v0 = vpop.f32.mrb[8].mxu1  ;;  %v640_v1 = vpop.f32.mrb[9].mxu0 }
 0x1db   : > { %1037 = vst [vmem:[#allocation2 + $0x18] sm:$0xff] %v1005_v61  ;;  %v864_v2 = vadd.f32 %v863_v0, %v638_v62  ;;  %v865_v3 = vpop.f32.mrb[9].mxu1  ;;  %v341_v62 = vld [vmem:[#allocation2 + $0x68] sm:$0xff] }
 0x1dd   : > { %v1006_v5 = vadd.f32 %v864_v2, %v332_v63  ;;  %v643_v6 = vpop.f32.mrb[10].mxu0 }
 0x1de   : > { %v868_v8 = vpop.f32.mrb[10].mxu1  ;;  %v645_v9 = vpop.f32.mrb[11].mxu0 }
 0x1df   : > { %1038 = vst [vmem:[#allocation2 + $0x20] sm:$0xff] %v1006_v5  ;;  %v869_v10 = vadd.f32 %v868_v8, %v643_v6  ;;  %v870_v11 = vpop.f32.mrb[11].mxu1  ;;  %v342_v6 = vld [vmem:[#allocation2 + $0x70] sm:$0xff] }
 0x1e1   : > { %v1007_v12 = vadd.f32 %v869_v10, %v333_v7  ;;  %v648_v13 = vpop.f32.mrb[12].mxu0 }
 0x1e2   : > { %v873_v15 = vpop.f32.mrb[12].mxu1  ;;  %v650_v16 = vpop.f32.mrb[13].mxu0 }
 0x1e3   : > { %1039 = vst [vmem:[#allocation2 + $0x28] sm:$0xff] %v1007_v12  ;;  %v874_v17 = vadd.f32 %v873_v15, %v648_v13  ;;  %v875_v18 = vpop.f32.mrb[13].mxu1  ;;  %v343_v13 = vld [vmem:[#allocation2 + $0x78] sm:$0xff] }
 0x1e5   : > { %v1008_v19 = vadd.f32 %v874_v17, %v334_v14  ;;  %v653_v20 = vpop.f32.mrb[14].mxu0 }
 0x1e6   : > { %v878_v22 = vpop.f32.mrb[14].mxu1  ;;  %v655_v23 = vpop.f32.mrb[15].mxu0 }
 0x1e7   : > { %1040 = vst [vmem:[#allocation2 + $0x30] sm:$0xff] %v1008_v19  ;;  %v879_v24 = vadd.f32 %v878_v22, %v653_v20  ;;  %v880_v25 = vpop.f32.mrb[15].mxu1  ;;  %v344_v20 = vld [vmem:[#allocation2 + $0x80] sm:$0xff] }
 0x1e9   : > { %v1009_v26 = vadd.f32 %v879_v24, %v335_v21  ;;  %v658_v27 = vpop.f32.mrb[16].mxu0 }
 0x1ea   : > { %v883_v29 = vpop.f32.mrb[16].mxu1  ;;  %v660_v30 = vpop.f32.mrb[17].mxu0 }
 0x1eb   : > { %1041 = vst [vmem:[#allocation2 + $0x38] sm:$0xff] %v1009_v26  ;;  %v884_v31 = vadd.f32 %v883_v29, %v658_v27  ;;  %v885_v32 = vpop.f32.mrb[17].mxu1  ;;  %v345_v27 = vld [vmem:[#allocation2 + $0x88] sm:$0xff] }
 0x1ed   : > { %v1010_v33 = vadd.f32 %v884_v31, %v336_v28  ;;  %v663_v34 = vpop.f32.mrb[18].mxu0 }
 0x1ee   : > { %v888_v36 = vpop.f32.mrb[18].mxu1  ;;  %v665_v37 = vpop.f32.mrb[19].mxu0 }
 0x1ef   : > { %1042 = vst [vmem:[#allocation2 + $0x40] sm:$0xff] %v1010_v33  ;;  %v889_v38 = vadd.f32 %v888_v36, %v663_v34  ;;  %v890_v39 = vpop.f32.mrb[19].mxu1  ;;  %v346_v34 = vld [vmem:[#allocation2 + $0x90] sm:$0xff] }
 0x1f1   : > { %v1011_v40 = vadd.f32 %v889_v38, %v337_v35  ;;  %v668_v41 = vpop.f32.mrb[20].mxu0 }
 0x1f2   : > { %v893_v43 = vpop.f32.mrb[20].mxu1  ;;  %v670_v4 = vpop.f32.mrb[21].mxu0 }
 0x1f3   : > { %1043 = vst [vmem:[#allocation2 + $0x48] sm:$0xff] %v1011_v40  ;;  %v894_v44 = vadd.f32 %v893_v43, %v668_v41  ;;  %v895_v45 = vpop.f32.mrb[21].mxu1  ;;  %v347_v41 = vld [vmem:[#allocation2 + $0x98] sm:$0xff] }
 0x1f5   : > { %v1012_v46 = vadd.f32 %v894_v44, %v338_v42  ;;  %v673_v47 = vpop.f32.mrb[22].mxu0 }
 0x1f6   : > { %v898_v49 = vpop.f32.mrb[22].mxu1  ;;  %v675_v50 = vpop.f32.mrb[23].mxu0 }
 0x1f7   : > { %1044 = vst [vmem:[#allocation2 + $0x50] sm:$0xff] %v1012_v46  ;;  %v899_v51 = vadd.f32 %v898_v49, %v673_v47  ;;  %v900_v52 = vpop.f32.mrb[23].mxu1  ;;  %v348_v47 = vld [vmem:[#allocation2 + $0xa0] sm:$0xff] }
 0x1f9   : > { %v1013_v53 = vadd.f32 %v899_v51, %v339_v48  ;;  %v678_v54 = vpop.f32.mrb[24].mxu0 }
 0x1fa   : > { %v903_v56 = vpop.f32.mrb[24].mxu1  ;;  %v680_v57 = vpop.f32.mrb[25].mxu0 }
 0x1fb   : > { %1045 = vst [vmem:[#allocation2 + $0x58] sm:$0xff] %v1013_v53  ;;  %v904_v58 = vadd.f32 %v903_v56, %v678_v54  ;;  %v905_v59 = vpop.f32.mrb[25].mxu1  ;;  %v349_v54 = vld [vmem:[#allocation2 + $0xa8] sm:$0xff] }
 0x1fd   : > { %v1014_v60 = vadd.f32 %v904_v58, %v340_v55  ;;  %v683_v61 = vpop.f32.mrb[26].mxu0 }
 0x1fe   : > { %v908_v63 = vpop.f32.mrb[26].mxu1  ;;  %v685_v0 = vpop.f32.mrb[27].mxu0 }
 0x1ff   : > { %1046 = vst [vmem:[#allocation2 + $0x60] sm:$0xff] %v1014_v60  ;;  %v909_v1 = vadd.f32 %v908_v63, %v683_v61  ;;  %v910_v2 = vpop.f32.mrb[27].mxu1  ;;  %v350_v61 = vld [vmem:[#allocation2 + $0xb0] sm:$0xff] }
 0x201   : > { %v1015_v3 = vadd.f32 %v909_v1, %v341_v62  ;;  %v688_v5 = vpop.f32.mrb[28].mxu0 }
 0x202   : > { %v913_v7 = vpop.f32.mrb[28].mxu1  ;;  %v690_v8 = vpop.f32.mrb[29].mxu0 }
 0x203   : > { %1047 = vst [vmem:[#allocation2 + $0x68] sm:$0xff] %v1015_v3  ;;  %v914_v9 = vadd.f32 %v913_v7, %v688_v5  ;;  %v915_v10 = vpop.f32.mrb[29].mxu1  ;;  %v351_v5 = vld [vmem:[#allocation2 + $0xb8] sm:$0xff] }
 0x205   : > { %v1016_v11 = vadd.f32 %v914_v9, %v342_v6  ;;  %v693_v12 = vpop.f32.mrb[30].mxu0 }
 0x206   : > { %v918_v14 = vpop.f32.mrb[30].mxu1  ;;  %v695_v15 = vpop.f32.mrb[31].mxu0 }
 0x207   : > { %1048 = vst [vmem:[#allocation2 + $0x70] sm:$0xff] %v1016_v11  ;;  %v919_v16 = vadd.f32 %v918_v14, %v693_v12  ;;  %v920_v17 = vpop.f32.mrb[31].mxu1  ;;  %v352_v12 = vld [vmem:[#allocation2 + $0xc0] sm:$0xff] }
 0x209   : > { %v1017_v18 = vadd.f32 %v919_v16, %v343_v13  ;;  %v698_v19 = vpop.f32.mrb[32].mxu0 }
 0x20a   : > { %v923_v21 = vpop.f32.mrb[32].mxu1  ;;  %v700_v22 = vpop.f32.mrb[33].mxu0 }
 0x20b   : > { %1049 = vst [vmem:[#allocation2 + $0x78] sm:$0xff] %v1017_v18  ;;  %v924_v23 = vadd.f32 %v923_v21, %v698_v19  ;;  %v925_v24 = vpop.f32.mrb[33].mxu1  ;;  %v353_v19 = vld [vmem:[#allocation2 + $0xc8] sm:$0xff] }
 0x20d   : > { %v1018_v25 = vadd.f32 %v924_v23, %v344_v20  ;;  %v703_v26 = vpop.f32.mrb[34].mxu0 }
 0x20e   : > { %v928_v28 = vpop.f32.mrb[34].mxu1  ;;  %v705_v29 = vpop.f32.mrb[35].mxu0 }
 0x20f   : > { %1050 = vst [vmem:[#allocation2 + $0x80] sm:$0xff] %v1018_v25  ;;  %v929_v30 = vadd.f32 %v928_v28, %v703_v26  ;;  %v930_v31 = vpop.f32.mrb[35].mxu1  ;;  %v354_v26 = vld [vmem:[#allocation2 + $0xd0] sm:$0xff] }
 0x211   : > { %v1019_v32 = vadd.f32 %v929_v30, %v345_v27  ;;  %v708_v33 = vpop.f32.mrb[36].mxu0 }
 0x212   : > { %v933_v35 = vpop.f32.mrb[36].mxu1  ;;  %v710_v36 = vpop.f32.mrb[37].mxu0 }
 0x213   : > { %1051 = vst [vmem:[#allocation2 + $0x88] sm:$0xff] %v1019_v32  ;;  %v934_v37 = vadd.f32 %v933_v35, %v708_v33  ;;  %v935_v38 = vpop.f32.mrb[37].mxu1  ;;  %v355_v33 = vld [vmem:[#allocation2 + $0xd8] sm:$0xff] }
 0x215   : > { %v1020_v39 = vadd.f32 %v934_v37, %v346_v34  ;;  %v713_v40 = vpop.f32.mrb[38].mxu0 }
 0x216   : > { %v938_v42 = vpop.f32.mrb[38].mxu1  ;;  %v715_v43 = vpop.f32.mrb[39].mxu0 }
 0x217   : > { %1052 = vst [vmem:[#allocation2 + $0x90] sm:$0xff] %v1020_v39  ;;  %v939_v4 = vadd.f32 %v938_v42, %v713_v40  ;;  %v940_v44 = vpop.f32.mrb[39].mxu1  ;;  %v356_v40 = vld [vmem:[#allocation2 + $0xe0] sm:$0xff] }
 0x219   : > { %v1021_v45 = vadd.f32 %v939_v4, %v347_v41  ;;  %v718_v46 = vpop.f32.mrb[40].mxu0 }
 0x21a   : > { %v943_v48 = vpop.f32.mrb[40].mxu1  ;;  %v720_v49 = vpop.f32.mrb[41].mxu0 }
 0x21b   : > { %1053 = vst [vmem:[#allocation2 + $0x98] sm:$0xff] %v1021_v45  ;;  %v944_v50 = vadd.f32 %v943_v48, %v718_v46  ;;  %v945_v51 = vpop.f32.mrb[41].mxu1  ;;  %v357_v46 = vld [vmem:[#allocation2 + $0xe8] sm:$0xff] }
 0x21d   : > { %v1022_v52 = vadd.f32 %v944_v50, %v348_v47  ;;  %v723_v53 = vpop.f32.mrb[42].mxu0 }
 0x21e   : > { %v948_v55 = vpop.f32.mrb[42].mxu1  ;;  %v725_v56 = vpop.f32.mrb[43].mxu0 }
 0x21f   : > { %1054 = vst [vmem:[#allocation2 + $0xa0] sm:$0xff] %v1022_v52  ;;  %v949_v57 = vadd.f32 %v948_v55, %v723_v53  ;;  %v950_v58 = vpop.f32.mrb[43].mxu1  ;;  %v358_v53 = vld [vmem:[#allocation2 + $0xf0] sm:$0xff] }
 0x221   : > { %v1023_v59 = vadd.f32 %v949_v57, %v349_v54  ;;  %v728_v60 = vpop.f32.mrb[44].mxu0 }
 0x222   : > { %v953_v62 = vpop.f32.mrb[44].mxu1  ;;  %v730_v63 = vpop.f32.mrb[45].mxu0 }
 0x223   : > { %1055 = vst [vmem:[#allocation2 + $0xa8] sm:$0xff] %v1023_v59  ;;  %v954_v0 = vadd.f32 %v953_v62, %v728_v60  ;;  %v955_v1 = vpop.f32.mrb[45].mxu1  ;;  %v359_v60 = vld [vmem:[#allocation2 + $0xf8] sm:$0xff] }
 0x225   : > { %v1024_v2 = vadd.f32 %v954_v0, %v350_v61  ;;  %v733_v3 = vpop.f32.mrb[46].mxu0 }
 0x226   : > { %v958_v6 = vpop.f32.mrb[46].mxu1  ;;  %v735_v7 = vpop.f32.mrb[47].mxu0 }
 0x227   : > { %1056 = vst [vmem:[#allocation2 + $0xb0] sm:$0xff] %v1024_v2  ;;  %v959_v8 = vadd.f32 %v958_v6, %v733_v3  ;;  %v960_v9 = vpop.f32.mrb[47].mxu1  ;;  %v1137_v2 = vld [vmem:[#allocation9 + $0x8] sm:$0xff] (!%p1642_p5)  ;;  %v1139_v3 = vld [vmem:[#allocation9 + $0x18] sm:$0xff] (!%p1642_p5)  ;;  %v1138_v7 = vld [vmem:[#allocation9 + $0x10] sm:$0xff] (!%p1642_p5) }
 0x228   : > { %v1749_v6 = vpack.c.bf16 (!%p1642_p5), %v1139_v3, %v1137_v2  ;;  %v1143_v9 = vld [vmem:[#allocation9 + $0x38] sm:$0xff] (!%p1642_p5) }
 0x229   : > { %v1025_v10 = vadd.f32 %v959_v8, %v351_v5  ;;  %v738_v11 = vpop.f32.mrb[48].mxu0  ;;  %v1136_v5 = vld [vmem:[#allocation9] sm:$0xff] (!%p1642_p5)  ;;  %v1141_v8 = vld [vmem:[#allocation9 + $0x28] sm:$0xff] (!%p1642_p5) }
 0x22a   : > { %v963_v13 = vpop.f32.mrb[48].mxu1  ;;  %v740_v14 = vpop.f32.mrb[49].mxu0  ;;  %1750 = vmatprep.subr.bf16.mxu0 (!%p1642_p5), %v1749_v6  ;;  %1781 = vmatprep.subr.bf16.mxu1 (!%p1642_p5), %v1749_v6  ;;  %v1091_v6 = vld [vmem:[#allocation2 + $0xa0] sm:$0xff] (!%p1642_p5) }
 0x22b   : > { %1057 = vst [vmem:[#allocation2 + $0xb8] sm:$0xff] %v1025_v10  ;;  %v964_v15 = vadd.f32 %v963_v13, %v738_v11  ;;  %v965_v16 = vpop.f32.mrb[49].mxu1  ;;  %v2207_v10 = vmov (!%p1642_p5), 0.0   ;;  %v1751_v11 = vpack.c.bf16 (!%p1642_p5), %v1138_v7, %v1136_v5  ;;  %v1140_v13 = vld [vmem:[#allocation9 + $0x20] sm:$0xff] (!%p1642_p5)  ;;  %v1142_v14 = vld [vmem:[#allocation9 + $0x30] sm:$0xff] (!%p1642_p5) }
 0x22c   : > { %1232 = vmatprep.mubr.f32.mxu0 (!%p1642_p5), %v2207_v10  ;;  %1328 = vmatprep.mubr.f32.mxu1 (!%p1642_p5), %v2207_v10  ;;  %v1147_v16 = vld [vmem:[#allocation9 + $0x58] sm:$0xff] (!%p1642_p5)  ;;  %v1075_v5 = vld [vmem:[#allocation2 + $0x20] sm:$0xff] (!%p1642_p5) }
 0x22d   : > { %v1026_v17 = vadd.f32 %v964_v15, %v352_v12  ;;  %v743_v18 = vpop.f32.mrb[50].mxu0  ;;  %v1753_v12 = vpack.c.bf16 (!%p1642_p5), %v1143_v9, %v1141_v8  ;;  %v1145_v15 = vld [vmem:[#allocation9 + $0x48] sm:$0xff] (!%p1642_p5)  ;;  %1752 = vmatpush1.bf16.msra.mxu0 (!%p1642_p5), %v1751_v11  ;;  %1789 = vmatpush1.bf16.msra.mxu1 (!%p1642_p5), %v1751_v11 }
 0x22e   : > { %v968_v20 = vpop.f32.mrb[50].mxu1  ;;  %v745_v21 = vpop.f32.mrb[51].mxu0  ;;  %v1076_v9 = vld [vmem:[#allocation2 + $0x28] sm:$0xff] (!%p1642_p5) }
 0x22f   : > { %1058 = vst [vmem:[#allocation2 + $0xc0] sm:$0xff] %v1026_v17  ;;  %v969_v22 = vadd.f32 %v968_v20, %v743_v18  ;;  %v970_v23 = vpop.f32.mrb[51].mxu1  ;;  %v1755_v17 = vpack.c.bf16 (!%p1642_p5), %v1142_v14, %v1140_v13  ;;  %1754 = vmatprep.subr.bf16.mxu0 (!%p1642_p5), %v1753_v12  ;;  %1782 = vmatprep.subr.bf16.mxu1 (!%p1642_p5), %v1753_v12  ;;  %v1146_v20 = vld [vmem:[#allocation9 + $0x50] sm:$0xff] (!%p1642_p5)  ;;  %v1149_v21 = vld [vmem:[#allocation9 + $0x68] sm:$0xff] (!%p1642_p5) }
 0x230   : > { %v1757_v18 = vpack.c.bf16 (!%p1642_p5), %v1147_v16, %v1145_v15  ;;  %v1092_v11 = vld [vmem:[#allocation2 + $0xa8] sm:$0xff] (!%p1642_p5)  ;;  %v1077_v14 = vld [vmem:[#allocation2 + $0x30] sm:$0xff] (!%p1642_p5) }
 0x231   : > { %v1027_v24 = vadd.f32 %v969_v22, %v353_v19  ;;  %v748_v25 = vpop.f32.mrb[52].mxu0  ;;  %v1144_v19 = vld [vmem:[#allocation9 + $0x40] sm:$0xff] (!%p1642_p5)  ;;  %v1151_v22 = vld [vmem:[#allocation9 + $0x78] sm:$0xff] (!%p1642_p5)  ;;  %1756 = vmatpush1.bf16.msra.mxu0 (!%p1642_p5), %v1755_v17  ;;  %1790 = vmatpush1.bf16.msra.mxu1 (!%p1642_p5), %v1755_v17  ;;  %v1093_v15 = vld [vmem:[#allocation2 + $0xb0] sm:$0xff] (!%p1642_p5) }
 0x232   : > { %v973_v27 = vpop.f32.mrb[52].mxu1  ;;  %v750_v28 = vpop.f32.mrb[53].mxu0  ;;  %v1759_v23 = vpack.c.bf16 (!%p1642_p5), %v1146_v20, %v1144_v19  ;;  %1758 = vmatprep.subr.bf16.mxu0 (!%p1642_p5), %v1757_v18  ;;  %1783 = vmatprep.subr.bf16.mxu1 (!%p1642_p5), %v1757_v18  ;;  %v1078_v18 = vld [vmem:[#allocation2 + $0x38] sm:$0xff] (!%p1642_p5) }
 0x233   : > { %1059 = vst [vmem:[#allocation2 + $0xc8] sm:$0xff] %v1027_v24  ;;  %v974_v29 = vadd.f32 %v973_v27, %v748_v25  ;;  %v975_v30 = vpop.f32.mrb[53].mxu1  ;;  %v1761_v24 = vpack.c.bf16 (!%p1642_p5), %v1151_v22, %v1149_v21  ;;  %v1148_v25 = vld [vmem:[#allocation9 + $0x60] sm:$0xff] (!%p1642_p5)  ;;  %v1153_v27 = vld [vmem:[#allocation9 + $0x88] sm:$0xff] (!%p1642_p5)  ;;  %v1155_v28 = vld [vmem:[#allocation9 + $0x98] sm:$0xff] (!%p1642_p5) }
 0x234   : > { %v1765_v30 = vpack.c.bf16 (!%p1642_p5), %v1155_v28, %v1153_v27  ;;  %v1094_v19 = vld [vmem:[#allocation2 + $0xb8] sm:$0xff] (!%p1642_p5)  ;;  %v1079_v22 = vld [vmem:[#allocation2 + $0x40] sm:$0xff] (!%p1642_p5) }
 0x235   : > { %v1028_v31 = vadd.f32 %v974_v29, %v354_v26  ;;  %v753_v32 = vpop.f32.mrb[54].mxu0  ;;  %v1150_v26 = vld [vmem:[#allocation9 + $0x70] sm:$0xff] (!%p1642_p5)  ;;  %1760 = vmatpush1.bf16.msra.mxu0 (!%p1642_p5), %v1759_v23  ;;  %1791 = vmatpush1.bf16.msra.mxu1 (!%p1642_p5), %v1759_v23 }
 0x236   : > { %v978_v34 = vpop.f32.mrb[54].mxu1  ;;  %v755_v35 = vpop.f32.mrb[55].mxu0  ;;  %v1763_v29 = vpack.c.bf16 (!%p1642_p5), %v1150_v26, %v1148_v25  ;;  %1762 = vmatprep.subr.bf16.mxu0 (!%p1642_p5), %v1761_v24  ;;  %1784 = vmatprep.subr.bf16.mxu1 (!%p1642_p5), %v1761_v24  ;;  %v1095_v23 = vld [vmem:[#allocation2 + $0xc0] sm:$0xff] (!%p1642_p5)  ;;  %v1080_v26 = vld [vmem:[#allocation2 + $0x48] sm:$0xff] (!%p1642_p5) }
 0x237   : > { %1060 = vst [vmem:[#allocation2 + $0xd0] sm:$0xff] %v1028_v31  ;;  %v979_v36 = vadd.f32 %v978_v34, %v753_v32  ;;  %v980_v37 = vpop.f32.mrb[55].mxu1  ;;  %v1152_v31 = vld [vmem:[#allocation9 + $0x80] sm:$0xff] (!%p1642_p5)  ;;  %v1154_v32 = vld [vmem:[#allocation9 + $0x90] sm:$0xff] (!%p1642_p5)  ;;  %v1159_v34 = vld [vmem:[#allocation9 + $0xb8] sm:$0xff] (!%p1642_p5) }
 0x238   : > { %v1767_v35 = vpack.c.bf16 (!%p1642_p5), %v1154_v32, %v1152_v31  ;;  %v1156_v37 = vld [vmem:[#allocation9 + $0xa0] sm:$0xff] (!%p1642_p5) }
 0x239   : > { %v1029_v38 = vadd.f32 %v979_v36, %v355_v33  ;;  %v758_v39 = vpop.f32.mrb[56].mxu0  ;;  %v1157_v33 = vld [vmem:[#allocation9 + $0xa8] sm:$0xff] (!%p1642_p5)  ;;  %1764 = vmatpush1.bf16.msra.mxu0 (!%p1642_p5), %v1763_v29  ;;  %1792 = vmatpush1.bf16.msra.mxu1 (!%p1642_p5), %v1763_v29 }
 0x23a   : > { %v983_v41 = vpop.f32.mrb[56].mxu1  ;;  %v760_v42 = vpop.f32.mrb[57].mxu0  ;;  %1766 = vmatprep.subr.bf16.mxu0 (!%p1642_p5), %v1765_v30  ;;  %1785 = vmatprep.subr.bf16.mxu1 (!%p1642_p5), %v1765_v30  ;;  %v1769_v36 = vpack.c.bf16 (!%p1642_p5), %v1159_v34, %v1157_v33  ;;  %v1096_v27 = vld [vmem:[#allocation2 + $0xc8] sm:$0xff] (!%p1642_p5)  ;;  %v1081_v30 = vld [vmem:[#allocation2 + $0x50] sm:$0xff] (!%p1642_p5)  ;;  %v1082_v34 = vld [vmem:[#allocation2 + $0x58] sm:$0xff] (!%p1642_p5) }
 0x23b   : > { %1061 = vst [vmem:[#allocation2 + $0xd8] sm:$0xff] %v1029_v38  ;;  %v984_v43 = vadd.f32 %v983_v41, %v758_v39  ;;  %v985_v4 = vpop.f32.mrb[57].mxu1  ;;  %v1158_v38 = vld [vmem:[#allocation9 + $0xb0] sm:$0xff] (!%p1642_p5)  ;;  %v1161_v39 = vld [vmem:[#allocation9 + $0xc8] sm:$0xff] (!%p1642_p5) }
 0x23c   : > { %v1771_v41 = vpack.c.bf16 (!%p1642_p5), %v1158_v38, %v1156_v37  ;;  %v1162_v4 = vld [vmem:[#allocation9 + $0xd0] sm:$0xff] (!%p1642_p5)  ;;  %v1083_v38 = vld [vmem:[#allocation2 + $0x60] sm:$0xff] (!%p1642_p5) }
 0x23d   : > { %v1030_v44 = vadd.f32 %v984_v43, %v356_v40  ;;  %v763_v45 = vpop.f32.mrb[58].mxu0  ;;  %v1163_v40 = vld [vmem:[#allocation9 + $0xd8] sm:$0xff] (!%p1642_p5)  ;;  %1768 = vmatpush1.bf16.msra.mxu0 (!%p1642_p5), %v1767_v35  ;;  %1793 = vmatpush1.bf16.msra.mxu1 (!%p1642_p5), %v1767_v35  ;;  %v1160_v43 = vld [vmem:[#allocation9 + $0xc0] sm:$0xff] (!%p1642_p5) }
 0x23e   : > { %v988_v47 = vpop.f32.mrb[58].mxu1  ;;  %v765_v48 = vpop.f32.mrb[59].mxu0  ;;  %1770 = vmatprep.subr.bf16.mxu0 (!%p1642_p5), %v1769_v36  ;;  %1786 = vmatprep.subr.bf16.mxu1 (!%p1642_p5), %v1769_v36  ;;  %v1773_v42 = vpack.c.bf16 (!%p1642_p5), %v1163_v40, %v1161_v39  ;;  %v1097_v31 = vld [vmem:[#allocation2 + $0xd0] sm:$0xff] (!%p1642_p5) }
 0x23f   : > { %1062 = vst [vmem:[#allocation2 + $0xe0] sm:$0xff] %v1030_v44  ;;  %v989_v49 = vadd.f32 %v988_v47, %v763_v45  ;;  %v990_v50 = vpop.f32.mrb[59].mxu1  ;;  %v1165_v44 = vld [vmem:[#allocation9 + $0xe8] sm:$0xff] (!%p1642_p5)  ;;  %v1167_v45 = vld [vmem:[#allocation9 + $0xf8] sm:$0xff] (!%p1642_p5)  ;;  %v1164_v48 = vld [vmem:[#allocation9 + $0xe0] sm:$0xff] (!%p1642_p5) }
 0x240   : > { %v1777_v47 = vpack.c.bf16 (!%p1642_p5), %v1167_v45, %v1165_v44  ;;  %v1085_v45 = vld [vmem:[#allocation2 + $0x70] sm:$0xff] (!%p1642_p5) }
 0x241   : > { %v1031_v51 = vadd.f32 %v989_v49, %v357_v46  ;;  %v768_v52 = vpop.f32.mrb[60].mxu0  ;;  %1772 = vmatpush1.bf16.msra.mxu0 (!%p1642_p5), %v1771_v41  ;;  %1794 = vmatpush1.bf16.msra.mxu1 (!%p1642_p5), %v1771_v41  ;;  %v1775_v46 = vpack.c.bf16 (!%p1642_p5), %v1162_v4, %v1160_v43  ;;  %v1166_v49 = vld [vmem:[#allocation9 + $0xf0] sm:$0xff] (!%p1642_p5) }
 0x242   : > { %v993_v54 = vpop.f32.mrb[60].mxu1  ;;  %v770_v55 = vpop.f32.mrb[61].mxu0  ;;  %1774 = vmatprep.subr.bf16.mxu0 (!%p1642_p5), %v1773_v42  ;;  %1787 = vmatprep.subr.bf16.mxu1 (!%p1642_p5), %v1773_v42  ;;  %v1779_v50 = vpack.c.bf16 (!%p1642_p5), %v1166_v49, %v1164_v48  ;;  %v1098_v35 = vld [vmem:[#allocation2 + $0xd8] sm:$0xff] (!%p1642_p5)  ;;  %v1084_v42 = vld [vmem:[#allocation2 + $0x68] sm:$0xff] (!%p1642_p5) }
 0x243   : > { %1063 = vst [vmem:[#allocation2 + $0xe8] sm:$0xff] %v1031_v51  ;;  %v994_v56 = vadd.f32 %v993_v54, %v768_v52  ;;  %v995_v57 = vpop.f32.mrb[61].mxu1  ;;  %v1071_v51 = vld [vmem:[#allocation2] sm:$0xff] (!%p1642_p5)  ;;  %v2756_v52 = vstv (!%p1642_p5), %s1070_s25  ;;  %v1086_v49 = vld [vmem:[#allocation2 + $0x78] sm:$0xff] (!%p1642_p5) }
 0x244   : > { %v1104_v54 = vmul.f32 (!%p1642_p5), %v2756_v52, %v1071_v51  ;;  %v1088_v57 = vld [vmem:[#allocation2 + $0x88] sm:$0xff] (!%p1642_p5)  ;;  %v1108_v7 = vmul.f32 (!%p1642_p5), %v2756_v52, %v1075_v5  ;;  %v1124_v8 = vmul.f32 (!%p1642_p5), %v2756_v52, %v1091_v6  ;;  %v1109_v12 = vmul.f32 (!%p1642_p5), %v2756_v52, %v1076_v9 }
 0x245   : > { %v1032_v58 = vadd.f32 %v994_v56, %v358_v53  ;;  %v773_v59 = vpop.f32.mrb[62].mxu0  ;;  %1069 = sbr.rel (%p1642_p5) target bundleno = 862 (0x35e), region = 56  ;;  %1776 = vmatpush1.bf16.msra.mxu0 (!%p1642_p5), %v1775_v46  ;;  %1795 = vmatpush1.bf16.msra.mxu1 (!%p1642_p5), %v1775_v46  ;;  %v1087_v53 = vld [vmem:[#allocation2 + $0x80] sm:$0xff] (!%p1642_p5)  ;;  %v1072_v56 = vld [vmem:[#allocation2 + $0x8] sm:$0xff] (!%p1642_p5)  ;;  %v1125_v13 = vmul.f32 (!%p1642_p5), %v2756_v52, %v1092_v11  ;;  %v1110_v16 = vmul.f32 (!%p1642_p5), %v2756_v52, %v1077_v14 }
 0x246   : > { %v998_v61 = vpop.f32.mrb[62].mxu1  ;;  %v775_v62 = vpop.f32.mrb[63].mxu0  ;;  %1778 = vmatprep.subr.bf16.mxu0 (!%p1642_p5), %v1777_v47  ;;  %1788 = vmatprep.subr.bf16.mxu1 (!%p1642_p5), %v1777_v47  ;;  %v1120_v55 = vmul.f32 (!%p1642_p5), %v2756_v52, %v1087_v53  ;;  %v1126_v17 = vmul.f32 (!%p1642_p5), %v2756_v52, %v1093_v15  ;;  %v1111_v20 = vmul.f32 (!%p1642_p5), %v2756_v52, %v1078_v18  ;;  %v1099_v39 = vld [vmem:[#allocation2 + $0xe0] sm:$0xff] (!%p1642_p5) }
 0x247   : > { %1064 = vst [vmem:[#allocation2 + $0xf0] sm:$0xff] %v1032_v58  ;;  %v999_v63 = vadd.f32 %v998_v61, %v773_v59  ;;  %v1000_v0 = vpop.f32.mrb[63].mxu1  ;;  %v1105_v58 = vmul.f32 (!%p1642_p5), %v2756_v52, %v1072_v56  ;;  %v1121_v59 = vmul.f32 (!%p1642_p5), %v2756_v52, %v1088_v57  ;;  %v1089_v61 = vld [vmem:[#allocation2 + $0x90] sm:$0xff] (!%p1642_p5)  ;;  %v1127_v21 = vmul.f32 (!%p1642_p5), %v2756_v52, %v1094_v19 }
 0x248   : > { %v1074_v0 = vld [vmem:[#allocation2 + $0x18] sm:$0xff] (!%p1642_p5)  ;;  %v1112_v24 = vmul.f32 (!%p1642_p5), %v2756_v52, %v1079_v22  ;;  %v1128_v25 = vmul.f32 (!%p1642_p5), %v2756_v52, %v1095_v23  ;;  %v1113_v28 = vmul.f32 (!%p1642_p5), %v2756_v52, %v1080_v26  ;;  %v1129_v29 = vmul.f32 (!%p1642_p5), %v2756_v52, %v1096_v27 }
 0x249   : > { %v1033_v1 = vadd.f32 %v999_v63, %v359_v60  ;;  %1780 = vmatpush1.bf16.msra.mxu0 (!%p1642_p5), %v1779_v50  ;;  %1796 = vmatpush1.bf16.msra.mxu1 (!%p1642_p5), %v1779_v50  ;;  %v1073_v60 = vld [vmem:[#allocation2 + $0x10] sm:$0xff] (!%p1642_p5)  ;;  %v1122_v63 = vmul.f32 (!%p1642_p5), %v2756_v52, %v1089_v61  ;;  %v1107_v2 = vmul.f32 (!%p1642_p5), %v2756_v52, %v1074_v0 }
 0x24a   : > { %v1106_v62 = vmul.f32 (!%p1642_p5), %v2756_v52, %v1073_v60  ;;  %v1114_v32 = vmul.f32 (!%p1642_p5), %v2756_v52, %v1081_v30  ;;  %v1130_v33 = vmul.f32 (!%p1642_p5), %v2756_v52, %v1097_v31  ;;  %v1115_v36 = vmul.f32 (!%p1642_p5), %v2756_v52, %v1082_v34  ;;  %v1100_v43 = vld [vmem:[#allocation2 + $0xe8] sm:$0xff] (!%p1642_p5) }
 0x24b   : > { %1065 = vst [vmem:[#allocation2 + $0xf8] sm:$0xff] %v1033_v1  ;;  %v1090_v1 = vld [vmem:[#allocation2 + $0x98] sm:$0xff] (!%p1642_p5)  ;;  %v1131_v37 = vmul.f32 (!%p1642_p5), %v2756_v52, %v1098_v35  ;;  %v1116_v40 = vmul.f32 (!%p1642_p5), %v2756_v52, %v1083_v38  ;;  %v1132_v41 = vmul.f32 (!%p1642_p5), %v2756_v52, %v1099_v39  ;;  %v1117_v4 = vmul.f32 (!%p1642_p5), %v2756_v52, %v1084_v42 }
 0x24c   : > { %1233 = vmatmul.mubr.f32.vlgmr.msra.gmra.mrb[0].mxu0 %v1104_v54  ;;  %1329 = vmatmul.mubr.f32.vlgmr.msra.gmra.mrb[0].mxu1 %v1120_v55  ;;  %v1123_v3 = vmul.f32 %v2756_v52, %v1090_v1  ;;  %v1133_v44 = vmul.f32 %v2756_v52, %v1100_v43  ;;  %v1118_v47 = vmul.f32 %v2756_v52, %v1085_v45 }
 0x24d   : > { %1238 = vmatprep.mubr.f32.mxu0 %v2207_v10  ;;  %1334 = vmatprep.mubr.f32.mxu1 %v2207_v10  ;;  %v1119_v51 = vmul.f32 %v2756_v52, %v1086_v49 }
 0x24e   : > { %v1101_v46 = vld [vmem:[#allocation2 + $0xf0] sm:$0xff] }
 0x24f   : > { %v1134_v48 = vmul.f32 %v2756_v52, %v1101_v46 }
 0x250   : > { %1239 = vmatmul.mubr.f32.gmra.mrb[2].mxu0 %v1105_v58  ;;  %1335 = vmatmul.mubr.f32.gmra.mrb[2].mxu1 %v1121_v59 }
 0x251   : > { %1244 = vmatprep.mubr.f32.mxu0 %v2207_v10  ;;  %1340 = vmatprep.mubr.f32.mxu1 %v2207_v10 }
 0x252   : > { %v1102_v50 = vld [vmem:[#allocation2 + $0xf8] sm:$0xff] }
 0x253   : > { %v1135_v53 = vmul.f32 %v2756_v52, %v1102_v50 }
 0x254   : > { %1245 = vmatmul.mubr.f32.gmra.mrb[4].mxu0 %v1106_v62  ;;  %1341 = vmatmul.mubr.f32.gmra.mrb[4].mxu1 %v1122_v63 }
 0x255   : > { %1250 = vmatprep.mubr.f32.mxu0 %v2207_v10  ;;  %1346 = vmatprep.mubr.f32.mxu1 %v2207_v10 }
 0x258   : > { %1251 = vmatmul.mubr.f32.gmra.mrb[6].mxu0 %v1107_v2  ;;  %1347 = vmatmul.mubr.f32.gmra.mrb[6].mxu1 %v1123_v3 }
 0x259   : > { %1256 = vmatprep.mubr.f32.mxu0 %v2207_v10  ;;  %1352 = vmatprep.mubr.f32.mxu1 %v2207_v10 }
 0x25c   : > { %1257 = vmatmul.mubr.f32.gmra.mrb[8].mxu0 %v1108_v7  ;;  %1353 = vmatmul.mubr.f32.gmra.mrb[8].mxu1 %v1124_v8 }
 0x25d   : > { %1262 = vmatprep.mubr.f32.mxu0 %v2207_v10  ;;  %1358 = vmatprep.mubr.f32.mxu1 %v2207_v10 }
 0x260   : > { %1263 = vmatmul.mubr.f32.gmra.mrb[10].mxu0 %v1109_v12  ;;  %1359 = vmatmul.mubr.f32.gmra.mrb[10].mxu1 %v1125_v13 }
 0x261   : > { %1268 = vmatprep.mubr.f32.mxu0 %v2207_v10  ;;  %1364 = vmatprep.mubr.f32.mxu1 %v2207_v10 }
 0x264   : > { %1269 = vmatmul.mubr.f32.gmra.mrb[12].mxu0 %v1110_v16  ;;  %1365 = vmatmul.mubr.f32.gmra.mrb[12].mxu1 %v1126_v17 }
 0x265   : > { %1274 = vmatprep.mubr.f32.mxu0 %v2207_v10  ;;  %1370 = vmatprep.mubr.f32.mxu1 %v2207_v10 }
 0x268   : > { %1275 = vmatmul.mubr.f32.gmra.mrb[14].mxu0 %v1111_v20  ;;  %1371 = vmatmul.mubr.f32.gmra.mrb[14].mxu1 %v1127_v21 }
 0x269   : > { %1280 = vmatprep.mubr.f32.mxu0 %v2207_v10  ;;  %1376 = vmatprep.mubr.f32.mxu1 %v2207_v10 }
 0x26c   : > { %1281 = vmatmul.mubr.f32.gmra.mrb[16].mxu0 %v1112_v24  ;;  %1377 = vmatmul.mubr.f32.gmra.mrb[16].mxu1 %v1128_v25 }
 0x26d   : > { %1286 = vmatprep.mubr.f32.mxu0 %v2207_v10  ;;  %1382 = vmatprep.mubr.f32.mxu1 %v2207_v10 }
 0x270   : > { %1287 = vmatmul.mubr.f32.gmra.mrb[18].mxu0 %v1113_v28  ;;  %1383 = vmatmul.mubr.f32.gmra.mrb[18].mxu1 %v1129_v29 }
 0x271   : > { %1292 = vmatprep.mubr.f32.mxu0 %v2207_v10  ;;  %1388 = vmatprep.mubr.f32.mxu1 %v2207_v10 }
 0x274   : > { %1293 = vmatmul.mubr.f32.gmra.mrb[20].mxu0 %v1114_v32  ;;  %1389 = vmatmul.mubr.f32.gmra.mrb[20].mxu1 %v1130_v33 }
 0x275   : > { %1298 = vmatprep.mubr.f32.mxu0 %v2207_v10  ;;  %1394 = vmatprep.mubr.f32.mxu1 %v2207_v10 }
 0x278   : > { %1299 = vmatmul.mubr.f32.gmra.mrb[22].mxu0 %v1115_v36  ;;  %1395 = vmatmul.mubr.f32.gmra.mrb[22].mxu1 %v1131_v37 }
 0x279   : > { %1304 = vmatprep.mubr.f32.mxu0 %v2207_v10  ;;  %1400 = vmatprep.mubr.f32.mxu1 %v2207_v10 }
 0x27c   : > { %1305 = vmatmul.mubr.f32.gmra.mrb[24].mxu0 %v1116_v40  ;;  %1401 = vmatmul.mubr.f32.gmra.mrb[24].mxu1 %v1132_v41 }
 0x27d   : > { %1310 = vmatprep.mubr.f32.mxu0 %v2207_v10  ;;  %1406 = vmatprep.mubr.f32.mxu1 %v2207_v10 }
 0x280   : > { %1311 = vmatmul.mubr.f32.gmra.mrb[26].mxu0 %v1117_v4  ;;  %1407 = vmatmul.mubr.f32.gmra.mrb[26].mxu1 %v1133_v44 }
 0x281   : > { %1316 = vmatprep.mubr.f32.mxu0 %v2207_v10  ;;  %1412 = vmatprep.mubr.f32.mxu1 %v2207_v10 }
 0x284   : > { %1317 = vmatmul.mubr.f32.gmra.mrb[28].mxu0 %v1118_v47  ;;  %1413 = vmatmul.mubr.f32.gmra.mrb[28].mxu1 %v1134_v48 }
 0x285   : > { %1322 = vmatprep.mubr.f32.mxu0 %v2207_v10  ;;  %1418 = vmatprep.mubr.f32.mxu1 %v2207_v10 }
 0x288   : > { %1323 = vmatmul.mubr.f32.gmra.mrb[30].mxu0 %v1119_v51  ;;  %1419 = vmatmul.mubr.f32.gmra.mrb[30].mxu1 %v1135_v53 }
 0x31f   : > { %v1234_v54 = vpop.f32.mrb[0].mxu0  ;;  %v1330_v55 = vpop.f32.mrb[0].mxu1 }
 0x320   : > { %1425 = vst [vmem:[%s2526_s13] sm:$0xff] %v1234_v54  ;;  %1457 = vst [vmem:[%s2526_s13 + $0x100] sm:$0xff] %v1330_v55  ;;  %v1236_v56 = vpop.f32.mrb[1].mxu0  ;;  %v1332_v57 = vpop.f32.mrb[1].mxu1 }
 0x321   : > { %1426 = vst [vmem:[%s2526_s13 + $0x8] sm:$0xff] %v1236_v56  ;;  %1458 = vst [vmem:[%s2526_s13 + $0x108] sm:$0xff] %v1332_v57 }
 0x323   : > { %v1240_v52 = vpop.f32.mrb[2].mxu0  ;;  %v1336_v58 = vpop.f32.mrb[2].mxu1 }
 0x324   : > { %1427 = vst [vmem:[%s2526_s13 + $0x10] sm:$0xff] %v1240_v52  ;;  %1459 = vst [vmem:[%s2526_s13 + $0x110] sm:$0xff] %v1336_v58  ;;  %v1242_v10 = vpop.f32.mrb[3].mxu0  ;;  %v1338_v59 = vpop.f32.mrb[3].mxu1 }
 0x325   : > { %1428 = vst [vmem:[%s2526_s13 + $0x18] sm:$0xff] %v1242_v10  ;;  %1460 = vst [vmem:[%s2526_s13 + $0x118] sm:$0xff] %v1338_v59 }
 0x327   : > { %v1246_v60 = vpop.f32.mrb[4].mxu0  ;;  %v1342_v61 = vpop.f32.mrb[4].mxu1 }
 0x328   : > { %1429 = vst [vmem:[%s2526_s13 + $0x20] sm:$0xff] %v1246_v60  ;;  %1461 = vst [vmem:[%s2526_s13 + $0x120] sm:$0xff] %v1342_v61  ;;  %v1248_v62 = vpop.f32.mrb[5].mxu0  ;;  %v1344_v63 = vpop.f32.mrb[5].mxu1 }
 0x329   : > { %1430 = vst [vmem:[%s2526_s13 + $0x28] sm:$0xff] %v1248_v62  ;;  %1462 = vst [vmem:[%s2526_s13 + $0x128] sm:$0xff] %v1344_v63 }
 0x32b   : > { %v1252_v0 = vpop.f32.mrb[6].mxu0  ;;  %v1348_v1 = vpop.f32.mrb[6].mxu1 }
 0x32c   : > { %1431 = vst [vmem:[%s2526_s13 + $0x30] sm:$0xff] %v1252_v0  ;;  %1463 = vst [vmem:[%s2526_s13 + $0x130] sm:$0xff] %v1348_v1  ;;  %v1254_v2 = vpop.f32.mrb[7].mxu0  ;;  %v1350_v3 = vpop.f32.mrb[7].mxu1 }
 0x32d   : > { %1432 = vst [vmem:[%s2526_s13 + $0x38] sm:$0xff] %v1254_v2  ;;  %1464 = vst [vmem:[%s2526_s13 + $0x138] sm:$0xff] %v1350_v3 }
 0x32f   : > { %v1258_v5 = vpop.f32.mrb[8].mxu0  ;;  %v1354_v6 = vpop.f32.mrb[8].mxu1 }
 0x330   : > { %1433 = vst [vmem:[%s2526_s13 + $0x40] sm:$0xff] %v1258_v5  ;;  %1465 = vst [vmem:[%s2526_s13 + $0x140] sm:$0xff] %v1354_v6  ;;  %v1260_v7 = vpop.f32.mrb[9].mxu0  ;;  %v1356_v8 = vpop.f32.mrb[9].mxu1 }
 0x331   : > { %1434 = vst [vmem:[%s2526_s13 + $0x48] sm:$0xff] %v1260_v7  ;;  %1466 = vst [vmem:[%s2526_s13 + $0x148] sm:$0xff] %v1356_v8 }
 0x333   : > { %v1264_v9 = vpop.f32.mrb[10].mxu0  ;;  %v1360_v11 = vpop.f32.mrb[10].mxu1 }
 0x334   : > { %1435 = vst [vmem:[%s2526_s13 + $0x50] sm:$0xff] %v1264_v9  ;;  %1467 = vst [vmem:[%s2526_s13 + $0x150] sm:$0xff] %v1360_v11  ;;  %v1266_v12 = vpop.f32.mrb[11].mxu0  ;;  %v1362_v13 = vpop.f32.mrb[11].mxu1 }
 0x335   : > { %1436 = vst [vmem:[%s2526_s13 + $0x58] sm:$0xff] %v1266_v12  ;;  %1468 = vst [vmem:[%s2526_s13 + $0x158] sm:$0xff] %v1362_v13 }
 0x337   : > { %v1270_v14 = vpop.f32.mrb[12].mxu0  ;;  %v1366_v15 = vpop.f32.mrb[12].mxu1 }
 0x338   : > { %1437 = vst [vmem:[%s2526_s13 + $0x60] sm:$0xff] %v1270_v14  ;;  %1469 = vst [vmem:[%s2526_s13 + $0x160] sm:$0xff] %v1366_v15  ;;  %v1272_v16 = vpop.f32.mrb[13].mxu0  ;;  %v1368_v17 = vpop.f32.mrb[13].mxu1 }
 0x339   : > { %1438 = vst [vmem:[%s2526_s13 + $0x68] sm:$0xff] %v1272_v16  ;;  %1470 = vst [vmem:[%s2526_s13 + $0x168] sm:$0xff] %v1368_v17 }
 0x33b   : > { %v1276_v18 = vpop.f32.mrb[14].mxu0  ;;  %v1372_v19 = vpop.f32.mrb[14].mxu1 }
 0x33c   : > { %1439 = vst [vmem:[%s2526_s13 + $0x70] sm:$0xff] %v1276_v18  ;;  %1471 = vst [vmem:[%s2526_s13 + $0x170] sm:$0xff] %v1372_v19  ;;  %v1278_v20 = vpop.f32.mrb[15].mxu0  ;;  %v1374_v21 = vpop.f32.mrb[15].mxu1 }
 0x33d   : > { %1440 = vst [vmem:[%s2526_s13 + $0x78] sm:$0xff] %v1278_v20  ;;  %1472 = vst [vmem:[%s2526_s13 + $0x178] sm:$0xff] %v1374_v21 }
 0x33f   : > { %v1282_v22 = vpop.f32.mrb[16].mxu0  ;;  %v1378_v23 = vpop.f32.mrb[16].mxu1 }
 0x340   : > { %1441 = vst [vmem:[%s2526_s13 + $0x80] sm:$0xff] %v1282_v22  ;;  %1473 = vst [vmem:[%s2526_s13 + $0x180] sm:$0xff] %v1378_v23  ;;  %v1284_v24 = vpop.f32.mrb[17].mxu0  ;;  %v1380_v25 = vpop.f32.mrb[17].mxu1 }
 0x341   : > { %1442 = vst [vmem:[%s2526_s13 + $0x88] sm:$0xff] %v1284_v24  ;;  %1474 = vst [vmem:[%s2526_s13 + $0x188] sm:$0xff] %v1380_v25 }
 0x343   : > { %v1288_v26 = vpop.f32.mrb[18].mxu0  ;;  %v1384_v27 = vpop.f32.mrb[18].mxu1 }
 0x344   : > { %1443 = vst [vmem:[%s2526_s13 + $0x90] sm:$0xff] %v1288_v26  ;;  %1475 = vst [vmem:[%s2526_s13 + $0x190] sm:$0xff] %v1384_v27  ;;  %v1290_v28 = vpop.f32.mrb[19].mxu0  ;;  %v1386_v29 = vpop.f32.mrb[19].mxu1 }
 0x345   : > { %1444 = vst [vmem:[%s2526_s13 + $0x98] sm:$0xff] %v1290_v28  ;;  %1476 = vst [vmem:[%s2526_s13 + $0x198] sm:$0xff] %v1386_v29 }
 0x347   : > { %v1294_v30 = vpop.f32.mrb[20].mxu0  ;;  %v1390_v31 = vpop.f32.mrb[20].mxu1 }
 0x348   : > { %1445 = vst [vmem:[%s2526_s13 + $0xa0] sm:$0xff] %v1294_v30  ;;  %1477 = vst [vmem:[%s2526_s13 + $0x1a0] sm:$0xff] %v1390_v31  ;;  %v1296_v32 = vpop.f32.mrb[21].mxu0  ;;  %v1392_v33 = vpop.f32.mrb[21].mxu1 }
 0x349   : > { %1446 = vst [vmem:[%s2526_s13 + $0xa8] sm:$0xff] %v1296_v32  ;;  %1478 = vst [vmem:[%s2526_s13 + $0x1a8] sm:$0xff] %v1392_v33 }
 0x34b   : > { %v1300_v34 = vpop.f32.mrb[22].mxu0  ;;  %v1396_v35 = vpop.f32.mrb[22].mxu1 }
 0x34c   : > { %1447 = vst [vmem:[%s2526_s13 + $0xb0] sm:$0xff] %v1300_v34  ;;  %1479 = vst [vmem:[%s2526_s13 + $0x1b0] sm:$0xff] %v1396_v35  ;;  %v1302_v36 = vpop.f32.mrb[23].mxu0  ;;  %v1398_v37 = vpop.f32.mrb[23].mxu1 }
 0x34d   : > { %1448 = vst [vmem:[%s2526_s13 + $0xb8] sm:$0xff] %v1302_v36  ;;  %1480 = vst [vmem:[%s2526_s13 + $0x1b8] sm:$0xff] %v1398_v37 }
 0x34f   : > { %v1306_v38 = vpop.f32.mrb[24].mxu0  ;;  %v1402_v39 = vpop.f32.mrb[24].mxu1 }
 0x350   : > { %1449 = vst [vmem:[%s2526_s13 + $0xc0] sm:$0xff] %v1306_v38  ;;  %1481 = vst [vmem:[%s2526_s13 + $0x1c0] sm:$0xff] %v1402_v39  ;;  %v1308_v40 = vpop.f32.mrb[25].mxu0  ;;  %v1404_v41 = vpop.f32.mrb[25].mxu1 }
 0x351   : > { %1450 = vst [vmem:[%s2526_s13 + $0xc8] sm:$0xff] %v1308_v40  ;;  %1482 = vst [vmem:[%s2526_s13 + $0x1c8] sm:$0xff] %v1404_v41 }
 0x353   : > { %v1312_v42 = vpop.f32.mrb[26].mxu0  ;;  %v1408_v43 = vpop.f32.mrb[26].mxu1 }
 0x354   : > { %1451 = vst [vmem:[%s2526_s13 + $0xd0] sm:$0xff] %v1312_v42  ;;  %1483 = vst [vmem:[%s2526_s13 + $0x1d0] sm:$0xff] %v1408_v43  ;;  %v1314_v4 = vpop.f32.mrb[27].mxu0  ;;  %v1410_v44 = vpop.f32.mrb[27].mxu1 }
 0x355   : > { %1452 = vst [vmem:[%s2526_s13 + $0xd8] sm:$0xff] %v1314_v4  ;;  %1484 = vst [vmem:[%s2526_s13 + $0x1d8] sm:$0xff] %v1410_v44 }
 0x357   : > { %v1318_v45 = vpop.f32.mrb[28].mxu0  ;;  %v1414_v46 = vpop.f32.mrb[28].mxu1 }
 0x358   : > { %1453 = vst [vmem:[%s2526_s13 + $0xe0] sm:$0xff] %v1318_v45  ;;  %1485 = vst [vmem:[%s2526_s13 + $0x1e0] sm:$0xff] %v1414_v46  ;;  %v1320_v47 = vpop.f32.mrb[29].mxu0  ;;  %v1416_v48 = vpop.f32.mrb[29].mxu1 }
 0x359   : > { %1454 = vst [vmem:[%s2526_s13 + $0xe8] sm:$0xff] %v1320_v47  ;;  %1486 = vst [vmem:[%s2526_s13 + $0x1e8] sm:$0xff] %v1416_v48 }
 0x35b   : > { %v1324_v49 = vpop.f32.mrb[30].mxu0  ;;  %v1420_v50 = vpop.f32.mrb[30].mxu1 }
 0x35c   : > { %1455 = vst [vmem:[%s2526_s13 + $0xf0] sm:$0xff] %v1324_v49  ;;  %1487 = vst [vmem:[%s2526_s13 + $0x1f0] sm:$0xff] %v1420_v50  ;;  %v1326_v51 = vpop.f32.mrb[31].mxu0  ;;  %v1422_v53 = vpop.f32.mrb[31].mxu1 }
 0x35d   : > { %1456 = vst [vmem:[%s2526_s13 + $0xf8] sm:$0xff] %v1326_v51  ;;  %1488 = vst [vmem:[%s2526_s13 + $0x1f8] sm:$0xff] %v1422_v53 }
 0x35e PF: > { %s3031_s4 = sld [smem:[#allocation18_spill]]  ;;  %s3033_s20 = sld [smem:[#allocation21_spill]] }
 0x35f   : > { %s3034_s14 = sld [smem:[#allocation26_spill]]  ;;  %s1504_s23 = sshll.u32 %s2526_s13, 4  ;;  %s2891_s23 = int_to_ptr.vmem [resolvable:$true] %s1504_s23 }
 0x360   : > { %s2895_s11 = scalar_lea.sflag [#allocation6], %s285_s18  ;;  %s2039_s3 = scalar_lea.vmem %s2891_s23, 8192 }
 0x361   : > { %p2040_p2 = scmp.ne.s32.totalorder %s2891_s23, %s2039_s3  ;;  %s2208_s7 = smov [#allocation10]  }
 0x362   : > { %s2043_s5 = sshll.u32 %s2208_s7, 4  ;;  %s2044_s5 = int_to_ptr.vmem [resolvable:$false] %s2043_s5 }
 0x363   : > { %s2045_s12 = scalar_lea.vmem %s2044_s5, 16384  ;;  %p2046_p4 = scmp.lt.s32.totalorder %s2891_s23, %s2044_s5 }
 0x364   : > { %s1652_s26 = sshll.u32 %s3031_s4, 13  ;;  %p3035_p10 = scmp.ne.s32.totalorder %s3033_s20, 0 }
 0x365   : > { %s2888_s6 = scalar_lea.hbm %s3034_s14, %s1652_s26  ;;  %p2047_p8 = scmp.lt.s32.totalorder %s2045_s12, %s2039_s3 }
 0x366   : > { %p2041_p7 = pnand %p2040_p2, %p3035_p10 }
 0x367   : > { %p2048_p12 = por %p2047_p8, %p2046_p4 }
 0x368   : > { %p2042_p11 = pneg %p2041_p7 }
 0x36a   : > { %p2049_p13 = pnand %p2048_p12, %p2042_p11 }
 0x36c   : > { %2052 = shalt.err (!%p2049_p13)
}
 0x36d   : > { %s2053_s18 = scalar_lea.hbm %s2888_s6, 8192  ;;  %s2057_s25 = scalar_lea.hbm %s3034_s14, 16384 }
 0x36e   : > { %p2054_p6 = scmp.ne.s32.totalorder %s2888_s6, %s2053_s18  ;;  %p2058_p3 = scmp.lt.u32.totalorder %s2888_s6, %s3034_s14 }
 0x36f   : > { %p2059_p9 = scmp.lt.u32.totalorder %s2057_s25, %s2053_s18  ;;  %p2061_p2 = scmp.lt.u32.totalorder %s2053_s18, %s2888_s6 }
 0x370   : > { %p2055_p0 = pnand %p2054_p6, %p3035_p10 }
 0x371   : > { %p2060_p5 = por %p2059_p9, %p2058_p3 }
 0x372   : > { %p2056_p1 = pneg %p2055_p0 }
 0x373   : > { %p2062_p7 = por %p2061_p2, %p2060_p5 }
 0x375   : > { %p2063_p11 = pnand %p2062_p7, %p2056_p1 }
 0x377   : > { %2066 = shalt.err (!%p2063_p11)
}
 0x378   : > { %s2209_s26 = smov 256   ;;  %s2210_s30 = smov 16  }
 0x379   : > { %1805 = dma.vmem_to_hbm [thread:$0]  (%p3035_p10), %s2891_s23, 8192, %s2888_s6, %s2895_s11, %s2209_s26, %s2209_s26, %s2210_s30  }
 0x37a PF: > { %s3036_s9 = sld [smem:[#allocation15_spill]]  ;;  %s3037_s3 = sld [smem:[#allocation22_spill]] }
 0x37b   : > { %p1825_p4 = scmp.ge.s32.totalorder %s2193_s29, 2 }
 0x380   : > { %s1519_s7 = sand.u32 1, %s3036_s9   ;;  %p3038_p8 = scmp.ne.s32.totalorder %s3037_s3, 0 }
 0x381   : > { %s1520_s5 = scalar_lea.sflag [#allocation6], %s1519_s7 }
 0x382   : > { %p1819_p12 = pnand %p1825_p4, %p3038_p8 }
 0x384   : > { %2136 = dma.done.wait (!%p1819_p12), %s1520_s5, 8192  }
 0x385   : > { %2138 = vsyncadd (!%p1819_p12), %s1520_s5, 4294959104  ;;  %s24_s29 = sadd.s32 1, %s2193_s29   ;;  %s3040_s18 = sld [smem:[#allocation16_spill]] }
 0x386   : > { %p2924_p13 = scmp.ge.s32.totalorder %s24_s29, 6   ;;  %s3041_s6 = smov %s2402_s17 }
 0x387   : > { %s3042_s11 = sld [smem:[#allocation23_spill]]  ;;  %s3043_s13 = sld [smem:[#allocation24_spill]] }
 0x388   : > { %s3047_s20 = smov %s2157_s21  ;;  %s3048_s21 = smov %s2161_s22 }
 0x389   : > { %s3049_s22 = smov %s2455_s8  ;;  %s3050_s23 = smov %s2169_s0 }
 0x38a   : > { %s3051_s0 = smov %s2173_s24  ;;  %s3052_s24 = smov %s3041_s6 }
 0x38b   : > { %s3044_s17 = smov %s3040_s18  ;;  %s3045_s18 = smov %s2149_s19 }
 0x38c   : > { %s3046_s19 = smov %s2399_s10  ;;  %s3053_s25 = smov %s2185_s27 }
 0x38d   : > { %s3054_s26 = smov %s2189_s28  ;;  %s3055_s27 = smov %s3042_s11 }
 0x38e   : > { %s3056_s28 = smov %s3043_s13  ;;  %23 = sbr.rel (!%p2924_p13) target bundleno = 16 (0x10), region = 106 }
 0x395   :  { %1525 = vsyncpa [#allocation5], 1 }
 0x396   :  { %1527 = vsyncpa [#allocation5 + $0x1], 1 }
 0x397   :  { %1528 = vsyncpa [#allocation8], 1 }
 0x398   :  { %1530 = vsyncpa [#allocation8 + $0x1], 1 }
 0x399   :  { %1531 = vsyncpa [#allocation6], 1 }
 0x39a   :  { %1533 = vsyncpa [#allocation6 + $0x1], 1 }

</bundles_post_ra>
